<compile_context>
chip_gen: v6e
topology: v6e:2x2x1
jax: 0.10.0
libtpu: 0.0.40
codegen_flags: <defaults>
</compile_context>

<pallas_src>
from dataclasses import dataclass
from functools import partial

import jax
import jax.numpy as jnp
from jax.experimental import pallas as pl
from jax.experimental.pallas import tpu as pltpu


# ----------------------------------------------------------------------------
# Config (mirrors SentenceTokenConfig)
# ----------------------------------------------------------------------------
@dataclass
class SentenceTokenConfig:
    use_global_contr: bool = False
    coeff_global_contr: float = 0.0
    global_contr_temp: float = 0.2
    use_sent_contr: bool = False
    coeff_sent_contr: float = 0.0
    sent_contr_temp: float = 0.25
    cross_sample_sentence_negatives: bool = True
    lambda_sent2reg: float = 0.0
    lambda_reg2sent: float = 1.0
    use_sent_mse: bool = False
    coeff_sent_mse: float = 0.0
    use_sent_gen: bool = False
    coeff_sent_gen: float = 0.0
    no_skip_roi_pool: bool = False


# ----------------------------------------------------------------------------
# VMEM budget / generation-aware tiling
# ----------------------------------------------------------------------------
def _vmem_limit_bytes():
    cap = 64 * 1024 * 1024                      # conservative (v7x physical)
    try:
        info = pltpu.get_tpu_info()
        cap = int(getattr(info, "vmem_capacity_bytes", cap))
    except Exception:
        pass
    # leave headroom for compiler-internal scratch
    return max(32 * 1024 * 1024, (cap * 3) // 4)


_VMEM_LIMIT = _vmem_limit_bytes()


def _mosaic_params(*semantics):
    return pltpu.CompilerParams(dimension_semantics=tuple(semantics),
                                vmem_limit_bytes=_VMEM_LIMIT)


def _pool_tiles(B, N, D):
    # bt must be a multiple of 8 or the whole batch (keeps the (bt, D) output
    # block legal); prefer >= 2 batch blocks so a v7x megacore can split them.
    bt = 8 if (B % 8 == 0 and B >= 16) else B
    if N <= 512:
        return bt, N, N
    nt = 2048
    while nt > 256 and 2 * bt * nt * D * 4 > (_VMEM_LIMIT * 3) // 5:
        nt //= 2
    n_pad = -(-N // nt) * nt
    return bt, nt, n_pad


def _xattn_batch_tile(B, S, P, D):
    # TODO(synk): if P*D ever gets too large for a single block, tile over P
    # with a flash-style online softmax; the stand-in keeps one P block.
    best = 1
    for d in range(1, B + 1):
        if B % d:
            continue
        if B >= 2 and B // d < 2:       # keep >= 2 grid blocks (v7x megacore)
            continue
        if 2 * d * (2 * S * D * 4 + P * D * 4) <= _VMEM_LIMIT // 2:
            best = d
    return best


def _pair_tile(N, D):
    if D >= 1024:
        base = 256
    elif _VMEM_LIMIT >= 80 * 1024 * 1024 and D <= 768:
        base = 1024                     # v5e/v6e: more MXU work per streamed byte
    else:
        base = 512                      # v7x default (64 MiB VMEM)
    if N <= base:
        if N >= 64 and N % 32 == 0:
            return N // 2, N            # two row blocks -> both v7x cores busy
        return N, N
    n_pad = -(-N // base) * base
    return base, n_pad


# ----------------------------------------------------------------------------
# Kernel 1: masked global average pooling (GlobalAvgPool aggregator)
# ----------------------------------------------------------------------------
def _masked_pool_kernel(x_ref, m_ref, o_ref, acc_ref, cnt_ref):
    j = pl.program_id(1)

    @pl.when(j == 0)
    def _init():
        acc_ref[...] = jnp.zeros_like(acc_ref)
        cnt_ref[...] = jnp.zeros_like(cnt_ref)

    x = x_ref[...].astype(jnp.float32)             # (Bt, Nt, D)
    m = m_ref[...].astype(jnp.float32)             # (Bt, 1, Nt)  lane-dense mask
    # M=1 batched matmul: this kernel is HBM-bound (x DMA dominates), so the
    # tiny MXU matmuls sit well off the critical path.
    acc_ref[...] += jnp.einsum('bkn,bnd->bkd', m, x,
                               preferred_element_type=jnp.float32)[:, 0, :]
    cnt_ref[...] += jnp.sum(m, axis=2)             # (Bt, 1)

    @pl.when(j == pl.num_programs(1) - 1)
    def _finalize():
        o_ref[...] = acc_ref[...] / jnp.maximum(cnt_ref[...], 1.0)


def masked_global_avg_pool(x, mask=None):
    B, N, D = x.shape
    if mask is None:
        mask = jnp.ones((B, N), jnp.float32)
    m = mask.astype(jnp.float32).reshape(B, 1, N)          # N on lanes
    bt, nt, n_pad = _pool_tiles(B, N, D)
    if n_pad != N:
        x = jnp.pad(x, ((0, 0), (0, n_pad - N), (0, 0)))
        m = jnp.pad(m, ((0, 0), (0, 0), (0, n_pad - N)))
    return pl.pallas_call(
        _masked_pool_kernel,
        out_shape=jax.ShapeDtypeStruct((B, D), jnp.float32),
        grid=(B // bt, n_pad // nt),
        in_specs=[
            pl.BlockSpec((bt, nt, D), lambda b, j: (b, j, 0)),
            pl.BlockSpec((bt, 1, nt), lambda b, j: (b, 0, j)),
        ],
        out_specs=pl.BlockSpec((bt, D), lambda b, j: (b, 0)),
        scratch_shapes=[pltpu.VMEM((bt, D), jnp.float32),
                        pltpu.VMEM((bt, 1), jnp.float32)],
        compiler_params=_mosaic_params("parallel", "arbitrary"),
    )(x, m)


# ----------------------------------------------------------------------------
# Kernel 2: cross-attention stand-in for model.detect_prompts(...)
# TODO(synk): the real ChEX token detector / ROI pooling is an external module
# with no provided source; this deterministic single-head cross-attention +
# linear projection stands in for its box_features output.
# ----------------------------------------------------------------------------
def _cross_attn_kernel(q_ref, kv_ref, w_ref, o_ref, *, scale):
    q = (q_ref[...].astype(jnp.float32) * scale).astype(jnp.bfloat16)   # (Bt,S,D)
    kv = kv_ref[...].astype(jnp.bfloat16)                                # (Bt,P,D)
    logits = jnp.einsum('bsd,bpd->bsp', q, kv,
                        preferred_element_type=jnp.float32)
    logits = logits - jnp.max(logits, axis=-1, keepdims=True)
    p = jnp.exp(logits)
    denom = jnp.sum(p, axis=-1, keepdims=True)                           # (Bt,S,1)
    attn = jnp.einsum('bsp,bpd->bsd', p.astype(jnp.bfloat16), kv,
                      preferred_element_type=jnp.float32)                # (Bt,S,D)
    attn = attn / denom                                                  # exact div
    bt, s, d = attn.shape
    w = w_ref[...].astype(jnp.bfloat16)
    proj = jnp.dot(attn.reshape(bt * s, d).astype(jnp.bfloat16), w,
                   preferred_element_type=jnp.float32)
    o_ref[...] = proj.reshape(bt, s, d)


def detect_prompts_standin(sentence_features, patch_features, w_proj):
    B, S, D = sentence_features.shape
    _, P, _ = patch_features.shape
    bt = _xattn_batch_tile(B, S, P, D)
    return pl.pallas_call(
        partial(_cross_attn_kernel, scale=float(1.0 / (D ** 0.5))),
        out_shape=jax.ShapeDtypeStruct((B, S, D), jnp.float32),
        grid=(B // bt,),
        in_specs=[
            pl.BlockSpec((bt, S, D), lambda b: (b, 0, 0)),
            pl.BlockSpec((bt, P, D), lambda b: (b, 0, 0)),
            pl.BlockSpec((D, D), lambda b: (0, 0)),
        ],
        out_specs=pl.BlockSpec((bt, S, D), lambda b: (b, 0, 0)),
        compiler_params=_mosaic_params("parallel"),
    )(sentence_features, patch_features, w_proj)


# ----------------------------------------------------------------------------
# Kernel 3: pair-contrastive prep (normalize + sqrt(1/temp) fold + bf16 cast
# + fused masked-MSE / valid-count partials).  One O(N*D) pass.
# ----------------------------------------------------------------------------
def _pair_prep_kernel(a_ref, b_ref, gid_ref, an_ref, bn_ref, st_ref, *, scale):
    a = a_ref[...].astype(jnp.float32)                       # (T, D)
    b = b_ref[...].astype(jnp.float32)
    an = a * (jax.lax.rsqrt(jnp.sum(a * a, axis=-1, keepdims=True) + 1e-12) * scale)
    bn = b * (jax.lax.rsqrt(jnp.sum(b * b, axis=-1, keepdims=True) + 1e-12) * scale)
    an_ref[...] = an.astype(jnp.bfloat16)
    bn_ref[...] = bn.astype(jnp.bfloat16)

    valid = (gid_ref[...] >= 0).astype(jnp.float32)          # (T, 1)
    diff = a - b
    mse = jnp.sum(valid * jnp.sum(diff * diff, axis=-1, keepdims=True))
    nv = jnp.sum(valid)
    lane = jax.lax.broadcasted_iota(jnp.int32, (1, 1, 128), 2)
    st_ref[...] = jnp.where(lane == 0, mse, jnp.where(lane == 1, nv, 0.0))


# ----------------------------------------------------------------------------
# Kernel 4: streaming pair-contrastive (both directions, flash-style LSE).
# Inputs are pre-normalized bf16 with sqrt(1/temp) folded into both sides.
# gid == -1 marks invalid rows; negatives of a valid row are all rows with the
# same gid (gid == 0 everywhere -> cross-sample, gid == sample id -> per-sample).
# ----------------------------------------------------------------------------
def _pair_contr_kernel(an_row_ref, bn_row_ref, an_col_ref, bn_col_ref,
                       gid_row_ref, gid_col_ref, out_ref,
                       m_ab_ref, l_ab_ref, m_ba_ref, l_ba_ref,
                       *, compute_ab, compute_ba):
    j = pl.program_id(1)
    neg = jnp.float32(-1e30)

    @pl.when(j == 0)
    def _init():
        m_ab_ref[...] = jnp.full_like(m_ab_ref, neg)
        l_ab_ref[...] = jnp.zeros_like(l_ab_ref)
        m_ba_ref[...] = jnp.full_like(m_ba_ref, neg)
        l_ba_ref[...] = jnp.zeros_like(l_ba_ref)

    an_i = an_row_ref[...]                          # (T, D) bf16, resident across j
    bn_i = bn_row_ref[...]
    an_j = an_col_ref[...]                          # (T, D) bf16 column stream
    bn_j = bn_col_ref[...]

    gid_r = gid_row_ref[...]                        # (T, 1) int32
    gid_c = gid_col_ref[...]                        # (1, T) int32, lane-dense
    pair_ok = gid_r == gid_c                        # (T, T) valid-negative mask

    dn = (((1,), (1,)), ((), ()))                   # contract last dims (no .T)

    def update(m_ref, l_ref, lg):
        lg_m = jnp.where(pair_ok, lg, neg)
        m_new = jnp.maximum(m_ref[...], jnp.max(lg_m, axis=-1, keepdims=True))
        # where-select keeps the all-invalid-first-block guard (exp(0) -> dropped)
        p = jnp.where(pair_ok, jnp.exp(lg_m - m_new), 0.0)
        l_ref[...] = (l_ref[...] * jnp.exp(m_ref[...] - m_new)
                      + jnp.sum(p, axis=-1, keepdims=True))
        m_ref[...] = m_new

    if compute_ab:
        lg_ab = jax.lax.dot_general(an_i, bn_j, dn,
                                    preferred_element_type=jnp.float32)
        update(m_ab_ref, l_ab_ref, lg_ab)
    if compute_ba:
        lg_ba = jax.lax.dot_general(bn_i, an_j, dn,
                                    preferred_element_type=jnp.float32)
        update(m_ba_ref, l_ba_ref, lg_ba)

    @pl.when(j == pl.num_programs(1) - 1)
    def _finalize():
        # positive-pair logit: O(T*D) VPU row-dot on the resident row blocks
        pos = jnp.sum(an_i.astype(jnp.float32) * bn_i.astype(jnp.float32),
                      axis=-1, keepdims=True)
        row_valid = (gid_r >= 0).astype(jnp.float32)
        tiny = jnp.float32(1e-30)
        if compute_ab:
            lse_ab = m_ab_ref[...] + jnp.log(jnp.maximum(l_ab_ref[...], tiny))
            p_ab = -jnp.sum(row_valid * (pos - lse_ab))
        else:
            p_ab = jnp.float32(0.0)
        if compute_ba:
            lse_ba = m_ba_ref[...] + jnp.log(jnp.maximum(l_ba_ref[...], tiny))
            p_ba = -jnp.sum(row_valid * (pos - lse_ba))
        else:
            p_ba = jnp.float32(0.0)
        lane = jax.lax.broadcasted_iota(jnp.int32, (1, 1, 128), 2)
        out_ref[...] = jnp.where(lane == 0, p_ab,
                                 jnp.where(lane == 1, p_ba, 0.0))


def _pair_contrastive_and_mse(a, b, gid, *, temp, lambda_ab, lambda_ba,
                              need_contr=True):
    """Returns (contrastive, mse). a, b: (N, D); gid: (N,) int32, -1 = invalid."""
    N, D = a.shape
    t, n_pad = _pair_tile(N, D)
    if n_pad != N:
        pad = n_pad - N
        a = jnp.pad(a, ((0, pad), (0, 0)))
        b = jnp.pad(b, ((0, pad), (0, 0)))
        gid = jnp.pad(gid, (0, pad), constant_values=-1)
    g = n_pad // t
    gid = gid.astype(jnp.int32)
    gid_row = gid.reshape(n_pad, 1)
    gid_col = gid.reshape(1, n_pad)

    scale = float(1.0 / temp) ** 0.5
    an, bn, stats = pl.pallas_call(
        partial(_pair_prep_kernel, scale=scale),
        out_shape=(jax.ShapeDtypeStruct((n_pad, D), jnp.bfloat16),
                   jax.ShapeDtypeStruct((n_pad, D), jnp.bfloat16),
                   jax.ShapeDtypeStruct((g, 1, 128), jnp.float32)),
        grid=(g,),
        in_specs=[pl.BlockSpec((t, D), lambda i: (i, 0)),
                  pl.BlockSpec((t, D), lambda i: (i, 0)),
                  pl.BlockSpec((t, 1), lambda i: (i, 0))],
        out_specs=(pl.BlockSpec((t, D), lambda i: (i, 0)),
                   pl.BlockSpec((t, D), lambda i: (i, 0)),
                   pl.BlockSpec((1, 1, 128), lambda i: (i, 0, 0))),
        compiler_params=_mosaic_params("parallel"),
    )(a, b, gid_row)

    stats_sum = jnp.sum(stats[:, 0, :], axis=0)
    n_valid = jnp.maximum(stats_sum[1], 1.0)
    mse = stats_sum[0] / (n_valid * D)

    compute_ab = float(lambda_ab) != 0.0
    compute_ba = float(lambda_ba) != 0.0
    if need_contr and (compute_ab or compute_ba):
        out = pl.pallas_call(
            partial(_pair_contr_kernel,
                    compute_ab=compute_ab, compute_ba=compute_ba),
            out_shape=jax.ShapeDtypeStruct((g, 1, 128), jnp.float32),
            grid=(g, g),
            in_specs=[
                pl.BlockSpec((t, D), lambda i, j: (i, 0)),   # a rows (bf16)
                pl.BlockSpec((t, D), lambda i, j: (i, 0)),   # b rows
                pl.BlockSpec((t, D), lambda i, j: (j, 0)),   # a cols
                pl.BlockSpec((t, D), lambda i, j: (j, 0)),   # b cols
                pl.BlockSpec((t, 1), lambda i, j: (i, 0)),   # gid rows
                pl.BlockSpec((1, t), lambda i, j: (0, j)),   # gid cols (lane-dense)
            ],
            out_specs=pl.BlockSpec((1, 1, 128), lambda i, j: (i, 0, 0)),
            scratch_shapes=[pltpu.VMEM((t, 1), jnp.float32) for _ in range(4)],
            compiler_params=_mosaic_params("parallel", "arbitrary"),
        )(an, bn, an, bn, gid_row, gid_col)
        partials = jnp.sum(out[:, 0, :], axis=0)
        contr = (lambda_ab * partials[0] + lambda_ba * partials[1]) / n_valid
    else:
        contr = jnp.float32(0.0)
    return contr, mse


# ----------------------------------------------------------------------------
# The supervisor
# ----------------------------------------------------------------------------
class SentenceTokenSupervisor:
    def __init__(self, config: SentenceTokenConfig, main_config=None, *, w_proj):
        self.config = config
        self.requires_sentence_tokens = True
        self.requires_anatomy_tokens = False
        self.requires_pathology_tokens = False
        self.requires_region_pathology_tokens = False
        self.w_proj = w_proj  # deterministic weight of the detect_prompts stand-in
        self._forward = jax.jit(self._forward_impl)

    def _forward_impl(self, patch_features, sentence_features, sentence_mask,
                      has_sentences):
        cfg = self.config
        if has_sentences is None:
            has_sentences = jnp.any(sentence_mask, axis=-1)
        B, S, D = sentence_features.shape

        # static-shape replacement for the boolean sample filtering of the
        # reference: samples without sentences are masked out of every loss.
        mask_eff = jnp.logical_and(sentence_mask, has_sentences[:, None])

        # "grounding": stand-in for model.detect_prompts(...).box_features
        sentence_region_features = detect_prompts_standin(
            sentence_features, patch_features, self.w_proj)

        aggregated_sentences = masked_global_avg_pool(sentence_features, mask_eff)
        aggregated_patches = masked_global_avg_pool(patch_features)

        sub_losses = {}
        loss = jnp.float32(0.0)

        if cfg.use_global_contr:
            sample_gid = jnp.where(has_sentences, 0, -1).astype(jnp.int32)
            l_global, _ = _pair_contrastive_and_mse(
                aggregated_patches, aggregated_sentences, sample_gid,
                temp=cfg.global_contr_temp, lambda_ab=0.5, lambda_ba=0.5)
            sub_losses['l_sent/global_contr'] = l_global
            loss = loss + cfg.coeff_global_contr * l_global

        if cfg.use_sent_contr or cfg.use_sent_mse:
            # TODO(synk): sentence_contrastive_loss / sentence_mse_loss sources are
            # external helpers; standard masked InfoNCE / masked MSE semantics assumed.
            if cfg.cross_sample_sentence_negatives:
                base = jnp.zeros((B, S), jnp.int32)
            else:
                base = jnp.broadcast_to(
                    jnp.arange(B, dtype=jnp.int32)[:, None], (B, S))
            sent_gid = jnp.where(mask_eff, base, -1).reshape(B * S)
            l_contr, l_mse = _pair_contrastive_and_mse(
                sentence_features.reshape(B * S, D),
                sentence_region_features.reshape(B * S, D),
                sent_gid, temp=cfg.sent_contr_temp,
                lambda_ab=cfg.lambda_sent2reg, lambda_ba=cfg.lambda_reg2sent,
                need_contr=cfg.use_sent_contr)
            if cfg.use_sent_contr:
                sub_losses['l_sent/sent_contr'] = l_contr
                loss = loss + cfg.coeff_sent_contr * l_contr
            if cfg.use_sent_mse:
                sub_losses['l_sent/sent_mse'] = l_mse
                loss = loss + cfg.coeff_sent_mse * l_mse

        # TODO(synk): use_sent_gen path requires model.train_sentence_decoder /
        # model.generate_sentences (external autoregressive decoder); not implemented.

        sub_losses['l_sent/total_sent'] = loss
        return (loss, sub_losses, sentence_region_features,
                aggregated_sentences, aggregated_patches, mask_eff)

    def __call__(self, patch_features, sentence_features, sentence_mask,
                 sentences=None, has_sentences=None, epoch=None, generate=False):
        (loss, sub_losses, sentence_region_features, aggregated_sentences,
         aggregated_patches, mask_eff) = self._forward(
            patch_features, sentence_features, sentence_mask, has_sentences)
        sent_outputs = {
            'sentences': sentences,
            'sentence_mask': mask_eff,
            'sentence_mask_in_all': sentence_mask,
            'sentence_region_features': sentence_region_features,
            'aggregated_sentences': aggregated_sentences,
            'aggregated_patches': aggregated_patches,
        }
        return loss, sub_losses, sent_outputs


# ----------------------------------------------------------------------------
# Demo
# ----------------------------------------------------------------------------
if __name__ == "__main__":
    key = jax.random.PRNGKey(0)
    B, S, P, D = 2, 8, 16, 32   # batch, sentences, patches, hidden
    k1, k2, k3 = jax.random.split(key, 3)

    patch_features = jax.random.normal(k1, (B, P, D), jnp.float32)
    sentence_features = jax.random.normal(k2, (B, S, D), jnp.float32)
    sentence_mask = jnp.array([[1, 1, 1, 1, 1, 0, 0, 0],
                               [1, 1, 1, 1, 1, 1, 1, 1]], dtype=bool)
    w_proj = jax.random.normal(k3, (D, D), jnp.float32) / jnp.sqrt(jnp.float32(D))

    cfg = SentenceTokenConfig(
        use_global_contr=True, coeff_global_contr=1.0, global_contr_temp=0.2,
        use_sent_contr=True, coeff_sent_contr=1.0, sent_contr_temp=0.25,
        cross_sample_sentence_negatives=True,
        lambda_sent2reg=0.0, lambda_reg2sent=1.0,
        use_sent_mse=True, coeff_sent_mse=0.5)
    supervisor = SentenceTokenSupervisor(cfg, main_config=None, w_proj=w_proj)

    loss, sub_losses, sent_outputs = supervisor(
        patch_features, sentence_features, sentence_mask)
    jax.block_until_ready(loss)
    jax.block_until_ready(sent_outputs['sentence_region_features'])

    assert jnp.isfinite(loss), "loss is not finite"
    for k, v in sub_losses.items():
        assert jnp.isfinite(v), f"{k} is not finite"
    assert sent_outputs['sentence_region_features'].shape == (B, S, D)
    assert sent_outputs['aggregated_sentences'].shape == (B, D)
    assert sent_outputs['aggregated_patches'].shape == (B, D)

    # also exercise the per-sample-negatives / both-directions path
    cfg2 = SentenceTokenConfig(
        use_sent_contr=True, coeff_sent_contr=1.0, sent_contr_temp=0.25,
        cross_sample_sentence_negatives=False,
        lambda_sent2reg=0.5, lambda_reg2sent=0.5)
    supervisor2 = SentenceTokenSupervisor(cfg2, main_config=None, w_proj=w_proj)
    loss2, sub_losses2, _ = supervisor2(
        patch_features, sentence_features, sentence_mask)
    jax.block_until_ready(loss2)
    assert jnp.isfinite(loss2), "per-sample-negatives loss is not finite"

    print("KERNEL_OK")
</pallas_src>

<mosaic_0001>
module attributes {stable_mosaic.version = 11 : i64} {
  func.func @_masked_pool_kernel(%arg0: i32, %arg1: i32, %arg2: memref<2x8x32xf32, #tpu.memory_space<vmem>>, %arg3: memref<2x1x8xf32, #tpu.memory_space<vmem>>, %arg4: memref<2x32xf32, #tpu.memory_space<vmem>>, %arg5: memref<2x32xf32, #tpu.memory_space<vmem>>, %arg6: memref<2x1xf32, #tpu.memory_space<vmem>>) attributes {dimension_semantics = [#tpu.dimension_semantics<parallel>, #tpu.dimension_semantics<arbitrary>], iteration_bounds = array<i64: 1, 1>, scalar_prefetch = 0 : i64, scratch_operands = 2 : i64, tpu.core_type = #tpu.core_type<tc>, window_params = [{transform_indices = @transform_0, window_bounds = array<i64: 2, 8, 32>}, {transform_indices = @transform_1, window_bounds = array<i64: 2, 1, 8>}, {transform_indices = @transform_2, window_bounds = array<i64: 2, 32>}]} {
    %c0_i32 = arith.constant 0 : i32
    %0 = arith.cmpi eq, %arg1, %c0_i32 : i32
    %1 = arith.extui %0 : i1 to i32
    %c0_i32_0 = arith.constant 0 : i32
    %2 = arith.cmpi ne, %1, %c0_i32_0 : i32
    scf.if %2 {
      %cst_17 = arith.constant 0.000000e+00 : f32
      %17 = vector.broadcast %cst_17 : f32 to vector<2x32xf32>
      %c0_18 = arith.constant 0 : index
      %c0_19 = arith.constant 0 : index
      %18 = vector.load %arg5[%c0_18, %c0_19] : memref<2x32xf32, #tpu.memory_space<vmem>>, vector<2x32xf32>
      tpu.vector_store %arg5[%c0_18, %c0_19], %17 {strides = array<i32>} : memref<2x32xf32, #tpu.memory_space<vmem>>, vector<2x32xf32>,
      %cst_20 = arith.constant 0.000000e+00 : f32
      %19 = vector.broadcast %cst_20 : f32 to vector<2x1xf32>
      %c0_21 = arith.constant 0 : index
      %c0_22 = arith.constant 0 : index
      %20 = vector.load %arg6[%c0_21, %c0_22] : memref<2x1xf32, #tpu.memory_space<vmem>>, vector<2x1xf32>
      tpu.vector_store %arg6[%c0_21, %c0_22], %19 {strides = array<i32>} : memref<2x1xf32, #tpu.memory_space<vmem>>, vector<2x1xf32>,
    } else {
    }
    %c0 = arith.constant 0 : index
    %c0_1 = arith.constant 0 : index
    %c0_2 = arith.constant 0 : index
    %3 = vector.load %arg2[%c0, %c0_1, %c0_2] : memref<2x8x32xf32, #tpu.memory_space<vmem>>, vector<2x8x32xf32>
    %c0_3 = arith.constant 0 : index
    %c0_4 = arith.constant 0 : index
    %c0_5 = arith.constant 0 : index
    %4 = vector.load %arg3[%c0_3, %c0_4, %c0_5] : memref<2x1x8xf32, #tpu.memory_space<vmem>>, vector<2x1x8xf32>
    %c0_6 = arith.constant 0 : index
    %c0_7 = arith.constant 0 : index
    %5 = vector.load %arg5[%c0_6, %c0_7] : memref<2x32xf32, #tpu.memory_space<vmem>>, vector<2x32xf32>
    "tpu.trace_start"() <{level = 10 : i32, message = "bkn,bnd->bkd"}> : () -> ()
    %cst = arith.constant dense<0.000000e+00> : vector<2x1x32xf32>
    %6 = tpu.matmul %4, %3, %cst {dimension_numbers = #tpu.dot_dimension_numbers<[2], [1], [1], [2], [0, 0, 0, 1, 1, 2], [0], [0]>} : vector<2x1x8xf32>, vector<2x8x32xf32>, vector<2x1x32xf32> -> vector<2x1x32xf32>
    "tpu.trace_stop"() : () -> ()
    %7 = vector.shape_cast %6 : vector<2x1x32xf32> to vector<2x32xf32>
    %8 = arith.addf %5, %7 : vector<2x32xf32>
    %c0_8 = arith.constant 0 : index
    %c0_9 = arith.constant 0 : index
    %9 = vector.load %arg5[%c0_8, %c0_9] : memref<2x32xf32, #tpu.memory_space<vmem>>, vector<2x32xf32>
    tpu.vector_store %arg5[%c0_8, %c0_9], %8 {strides = array<i32>} : memref<2x32xf32, #tpu.memory_space<vmem>>, vector<2x32xf32>,
    %c0_10 = arith.constant 0 : index
    %c0_11 = arith.constant 0 : index
    %10 = vector.load %arg6[%c0_10, %c0_11] : memref<2x1xf32, #tpu.memory_space<vmem>>, vector<2x1xf32>
    %cst_12 = arith.constant dense<0.000000e+00> : vector<2x1xf32>
    %11 = vector.multi_reduction <add>, %4, %cst_12 [2] : vector<2x1x8xf32> to vector<2x1xf32>
    %12 = arith.addf %10, %11 : vector<2x1xf32>
    %c0_13 = arith.constant 0 : index
    %c0_14 = arith.constant 0 : index
    %13 = vector.load %arg6[%c0_13, %c0_14] : memref<2x1xf32, #tpu.memory_space<vmem>>, vector<2x1xf32>
    tpu.vector_store %arg6[%c0_13, %c0_14], %12 {strides = array<i32>} : memref<2x1xf32, #tpu.memory_space<vmem>>, vector<2x1xf32>,
    %c0_i32_15 = arith.constant 0 : i32
    %14 = arith.cmpi eq, %arg1, %c0_i32_15 : i32
    %15 = arith.extui %14 : i1 to i32
    %c0_i32_16 = arith.constant 0 : i32
    %16 = arith.cmpi ne, %15, %c0_i32_16 : i32
    scf.if %16 {
      %c0_17 = arith.constant 0 : index
      %c0_18 = arith.constant 0 : index
      %17 = vector.load %arg5[%c0_17, %c0_18] : memref<2x32xf32, #tpu.memory_space<vmem>>, vector<2x32xf32>
      %c0_19 = arith.constant 0 : index
      %c0_20 = arith.constant 0 : index
      %18 = vector.load %arg6[%c0_19, %c0_20] : memref<2x1xf32, #tpu.memory_space<vmem>>, vector<2x1xf32>
      %cst_21 = arith.constant 1.000000e+00 : f32
      %19 = vector.broadcast %cst_21 : f32 to vector<2x1xf32>
      %20 = arith.maximumf %18, %19 : vector<2x1xf32>
      %21 = vector.broadcast %20 : vector<2x1xf32> to vector<2x32xf32>
      %22 = arith.divf %17, %21 : vector<2x32xf32>
      %c0_22 = arith.constant 0 : index
      %c0_23 = arith.constant 0 : index
      %23 = vector.load %arg4[%c0_22, %c0_23] : memref<2x32xf32, #tpu.memory_space<vmem>>, vector<2x32xf32>
      tpu.vector_store %arg4[%c0_22, %c0_23], %22 {strides = array<i32>} : memref<2x32xf32, #tpu.memory_space<vmem>>, vector<2x32xf32>,
    } else {
    }
    return
  }
  func.func @transform_0(%arg0: i32, %arg1: i32) -> (i32, i32, i32) {
    %c0_i32 = arith.constant 0 : i32
    %c0_i32_0 = arith.constant 0 : i32
    return %arg0, %arg1, %c0_i32 : i32, i32, i32
  }
  func.func @transform_1(%arg0: i32, %arg1: i32) -> (i32, i32, i32) {
    %c0_i32 = arith.constant 0 : i32
    %c0_i32_0 = arith.constant 0 : i32
    return %arg0, %c0_i32, %arg1 : i32, i32, i32
  }
  func.func @transform_2(%arg0: i32, %arg1: i32) -> (i32, i32) {
    %c0_i32 = arith.constant 0 : i32
    %c0_i32_0 = arith.constant 0 : i32
    return %arg0, %c0_i32 : i32, i32
  }
}

module attributes {stable_mosaic.version = 11 : i64} {
  func.func @_pair_prep_kernel(%arg0: i32, %arg1: memref<2x32xf32, #tpu.memory_space<vmem>>, %arg2: memref<2x32xf32, #tpu.memory_space<vmem>>, %arg3: memref<2x1xi32, #tpu.memory_space<vmem>>, %arg4: memref<2x32xbf16, #tpu.memory_space<vmem>>, %arg5: memref<2x32xbf16, #tpu.memory_space<vmem>>, %arg6: memref<1x1x128xf32, #tpu.memory_space<vmem>>) attributes {dimension_semantics = [#tpu.dimension_semantics<parallel>], iteration_bounds = array<i64: 1>, scalar_prefetch = 0 : i64, scratch_operands = 0 : i64, tpu.core_type = #tpu.core_type<tc>, window_params = [{transform_indices = @transform_0, window_bounds = array<i64: 2, 32>}, {transform_indices = @transform_1, window_bounds = array<i64: 2, 32>}, {transform_indices = @transform_2, window_bounds = array<i64: 2, 1>}, {transform_indices = @transform_3, window_bounds = array<i64: 2, 32>}, {transform_indices = @transform_4, window_bounds = array<i64: 2, 32>}, {transform_indices = @transform_5, window_bounds = array<i64: 1, 1, 128>}]} {
    %c0 = arith.constant 0 : index
    %c0_0 = arith.constant 0 : index
    %0 = vector.load %arg1[%c0, %c0_0] : memref<2x32xf32, #tpu.memory_space<vmem>>, vector<2x32xf32>
    %c0_1 = arith.constant 0 : index
    %c0_2 = arith.constant 0 : index
    %1 = vector.load %arg2[%c0_1, %c0_2] : memref<2x32xf32, #tpu.memory_space<vmem>>, vector<2x32xf32>
    %2 = arith.mulf %0, %0 : vector<2x32xf32>
    %cst = arith.constant dense<0.000000e+00> : vector<2xf32>
    %3 = vector.multi_reduction <add>, %2, %cst [1] : vector<2x32xf32> to vector<2xf32>
    %4 = vector.shape_cast %3 : vector<2xf32> to vector<2x1xf32>
    %cst_3 = arith.constant 9.99999996E-13 : f32
    %5 = vector.broadcast %cst_3 : f32 to vector<2x1xf32>
    %6 = arith.addf %4, %5 : vector<2x1xf32>
    %7 = math.rsqrt %6 : vector<2x1xf32>
    %cst_4 = arith.constant 2.23606801 : f32
    %8 = vector.broadcast %cst_4 : f32 to vector<2x1xf32>
    %9 = arith.mulf %7, %8 : vector<2x1xf32>
    %10 = vector.broadcast %9 : vector<2x1xf32> to vector<2x32xf32>
    %11 = arith.mulf %0, %10 : vector<2x32xf32>
    %12 = arith.mulf %1, %1 : vector<2x32xf32>
    %cst_5 = arith.constant dense<0.000000e+00> : vector<2xf32>
    %13 = vector.multi_reduction <add>, %12, %cst_5 [1] : vector<2x32xf32> to vector<2xf32>
    %14 = vector.shape_cast %13 : vector<2xf32> to vector<2x1xf32>
    %cst_6 = arith.constant 9.99999996E-13 : f32
    %15 = vector.broadcast %cst_6 : f32 to vector<2x1xf32>
    %16 = arith.addf %14, %15 : vector<2x1xf32>
    %17 = math.rsqrt %16 : vector<2x1xf32>
    %cst_7 = arith.constant 2.23606801 : f32
    %18 = vector.broadcast %cst_7 : f32 to vector<2x1xf32>
    %19 = arith.mulf %17, %18 : vector<2x1xf32>
    %20 = vector.broadcast %19 : vector<2x1xf32> to vector<2x32xf32>
    %21 = arith.mulf %1, %20 : vector<2x32xf32>
    %22 = arith.truncf %11 : vector<2x32xf32> to vector<2x32xbf16>
    %c0_8 = arith.constant 0 : index
    %c0_9 = arith.constant 0 : index
    %23 = vector.load %arg4[%c0_8, %c0_9] : memref<2x32xbf16, #tpu.memory_space<vmem>>, vector<2x32xbf16>
    tpu.vector_store %arg4[%c0_8, %c0_9], %22 {strides = array<i32>} : memref<2x32xbf16, #tpu.memory_space<vmem>>, vector<2x32xbf16>,
    %24 = arith.truncf %21 : vector<2x32xf32> to vector<2x32xbf16>
    %c0_10 = arith.constant 0 : index
    %c0_11 = arith.constant 0 : index
    %25 = vector.load %arg5[%c0_10, %c0_11] : memref<2x32xbf16, #tpu.memory_space<vmem>>, vector<2x32xbf16>
    tpu.vector_store %arg5[%c0_10, %c0_11], %24 {strides = array<i32>} : memref<2x32xbf16, #tpu.memory_space<vmem>>, vector<2x32xbf16>,
    %c0_12 = arith.constant 0 : index
    %c0_13 = arith.constant 0 : index
    %26 = vector.load %arg3[%c0_12, %c0_13] : memref<2x1xi32, #tpu.memory_space<vmem>>, vector<2x1xi32>
    %c0_i32 = arith.constant 0 : i32
    %27 = vector.broadcast %c0_i32 : i32 to vector<2x1xi32>
    %28 = arith.cmpi sge, %26, %27 : vector<2x1xi32>
    %29 = arith.extui %28 : vector<2x1xi1> to vector<2x1xi32>
    %30 = arith.sitofp %29 : vector<2x1xi32> to vector<2x1xf32>
    %31 = arith.subf %0, %1 : vector<2x32xf32>
    %32 = arith.mulf %31, %31 : vector<2x32xf32>
    %cst_14 = arith.constant dense<0.000000e+00> : vector<2xf32>
    %33 = vector.multi_reduction <add>, %32, %cst_14 [1] : vector<2x32xf32> to vector<2xf32>
    %34 = vector.shape_cast %33 : vector<2xf32> to vector<2x1xf32>
    %35 = arith.mulf %30, %34 : vector<2x1xf32>
    %36 = vector.shape_cast %35 : vector<2x1xf32> to vector<1x2x1xf32>
    %cst_15 = arith.constant dense<0.000000e+00> : vector<1xf32>
    %37 = vector.multi_reduction <add>, %36, %cst_15 [1, 2] : vector<1x2x1xf32> to vector<1xf32>
    %38 = vector.shape_cast %37 : vector<1xf32> to vector<1x1x1xf32>
    %39 = vector.extract %38[0, 0, 0] : f32 from vector<1x1x1xf32>
    %40 = vector.shape_cast %30 : vector<2x1xf32> to vector<1x2x1xf32>
    %cst_16 = arith.constant dense<0.000000e+00> : vector<1xf32>
    %41 = vector.multi_reduction <add>, %40, %cst_16 [1, 2] : vector<1x2x1xf32> to vector<1xf32>
    %42 = vector.shape_cast %41 : vector<1xf32> to vector<1x1x1xf32>
    %43 = vector.extract %42[0, 0, 0] : f32 from vector<1x1x1xf32>
    %44 = tpu.iota {dimensions = array<i32: 2>} : vector<1x1x128xi32>
    %c0_i32_17 = arith.constant 0 : i32
    %45 = vector.broadcast %c0_i32_17 : i32 to vector<1x1x128xi32>
    %46 = arith.cmpi eq, %44, %45 : vector<1x1x128xi32>
    %c1_i32 = arith.constant 1 : i32
    %47 = vector.broadcast %c1_i32 : i32 to vector<1x1x128xi32>
    %48 = arith.cmpi eq, %44, %47 : vector<1x1x128xi32>
    %cst_18 = arith.constant 0.000000e+00 : f32
    %49 = vector.broadcast %43 : f32 to vector<1x1x128xf32>
    %50 = vector.broadcast %cst_18 : f32 to vector<1x1x128xf32>
    %51 = arith.select %48, %49, %50 : vector<1x1x128xi1>, vector<1x1x128xf32>
    %52 = vector.broadcast %39 : f32 to vector<1x1x128xf32>
    %53 = arith.select %46, %52, %51 : vector<1x1x128xi1>, vector<1x1x128xf32>
    %c0_19 = arith.constant 0 : index
    %c0_20 = arith.constant 0 : index
    %c0_21 = arith.constant 0 : index
    %54 = vector.load %arg6[%c0_19, %c0_20, %c0_21] : memref<1x1x128xf32, #tpu.memory_space<vmem>>, vector<1x1x128xf32>
    tpu.vector_store %arg6[%c0_19, %c0_20, %c0_21], %53 {strides = array<i32>} : memref<1x1x128xf32, #tpu.memory_space<vmem>>, vector<1x1x128xf32>,
    return
  }
  func.func @transform_0(%arg0: i32) -> (i32, i32) {
    %c0_i32 = arith.constant 0 : i32
    %c0_i32_0 = arith.constant 0 : i32
    return %arg0, %c0_i32 : i32, i32
  }
  func.func @transform_1(%arg0: i32) -> (i32, i32) {
    %c0_i32 = arith.constant 0 : i32
    %c0_i32_0 = arith.constant 0 : i32
    return %arg0, %c0_i32 : i32, i32
  }
  func.func @transform_2(%arg0: i32) -> (i32, i32) {
    %c0_i32 = arith.constant 0 : i32
    %c0_i32_0 = arith.constant 0 : i32
    return %arg0, %c0_i32 : i32, i32
  }
  func.func @transform_3(%arg0: i32) -> (i32, i32) {
    %c0_i32 = arith.constant 0 : i32
    %c0_i32_0 = arith.constant 0 : i32
    return %arg0, %c0_i32 : i32, i32
  }
  func.func @transform_4(%arg0: i32) -> (i32, i32) {
    %c0_i32 = arith.constant 0 : i32
    %c0_i32_0 = arith.constant 0 : i32
    return %arg0, %c0_i32 : i32, i32
  }
  func.func @transform_5(%arg0: i32) -> (i32, i32, i32) {
    %c0_i32 = arith.constant 0 : i32
    %c0_i32_0 = arith.constant 0 : i32
    %c0_i32_1 = arith.constant 0 : i32
    return %arg0, %c0_i32, %c0_i32_0 : i32, i32, i32
  }
}

module attributes {stable_mosaic.version = 11 : i64} {
  func.func @_pair_contr_kernel(%arg0: i32, %arg1: i32, %arg2: memref<2x32xbf16, #tpu.memory_space<vmem>>, %arg3: memref<2x32xbf16, #tpu.memory_space<vmem>>, %arg4: memref<2x32xbf16, #tpu.memory_space<vmem>>, %arg5: memref<2x32xbf16, #tpu.memory_space<vmem>>, %arg6: memref<2x1xi32, #tpu.memory_space<vmem>>, %arg7: memref<1x2xi32, #tpu.memory_space<vmem>>, %arg8: memref<1x1x128xf32, #tpu.memory_space<vmem>>, %arg9: memref<2x1xf32, #tpu.memory_space<vmem>>, %arg10: memref<2x1xf32, #tpu.memory_space<vmem>>, %arg11: memref<2x1xf32, #tpu.memory_space<vmem>>, %arg12: memref<2x1xf32, #tpu.memory_space<vmem>>) attributes {dimension_semantics = [#tpu.dimension_semantics<parallel>, #tpu.dimension_semantics<arbitrary>], iteration_bounds = array<i64: 1, 1>, scalar_prefetch = 0 : i64, scratch_operands = 4 : i64, tpu.core_type = #tpu.core_type<tc>, window_params = [{transform_indices = @transform_0, window_bounds = array<i64: 2, 32>}, {transform_indices = @transform_1, window_bounds = array<i64: 2, 32>}, {transform_indices = @transform_2, window_bounds = array<i64: 2, 32>}, {transform_indices = @transform_3, window_bounds = array<i64: 2, 32>}, {transform_indices = @transform_4, window_bounds = array<i64: 2, 1>}, {transform_indices = @transform_5, window_bounds = array<i64: 1, 2>}, {transform_indices = @transform_6, window_bounds = array<i64: 1, 1, 128>}]} {
    %c0_i32 = arith.constant 0 : i32
    %0 = arith.cmpi eq, %arg1, %c0_i32 : i32
    %1 = arith.extui %0 : i1 to i32
    %cst = arith.constant -1.000000e+30 : f32
    %c0_i32_0 = arith.constant 0 : i32
    %2 = arith.cmpi ne, %1, %c0_i32_0 : i32
    scf.if %2 {
      %59 = vector.broadcast %cst : f32 to vector<2x1xf32>
      %c0_44 = arith.constant 0 : index
      %c0_45 = arith.constant 0 : index
      %60 = vector.load %arg9[%c0_44, %c0_45] : memref<2x1xf32, #tpu.memory_space<vmem>>, vector<2x1xf32>
      tpu.vector_store %arg9[%c0_44, %c0_45], %59 {strides = array<i32>} : memref<2x1xf32, #tpu.memory_space<vmem>>, vector<2x1xf32>,
      %cst_46 = arith.constant 0.000000e+00 : f32
      %61 = vector.broadcast %cst_46 : f32 to vector<2x1xf32>
      %c0_47 = arith.constant 0 : index
      %c0_48 = arith.constant 0 : index
      %62 = vector.load %arg10[%c0_47, %c0_48] : memref<2x1xf32, #tpu.memory_space<vmem>>, vector<2x1xf32>
      tpu.vector_store %arg10[%c0_47, %c0_48], %61 {strides = array<i32>} : memref<2x1xf32, #tpu.memory_space<vmem>>, vector<2x1xf32>,
      %63 = vector.broadcast %cst : f32 to vector<2x1xf32>
      %c0_49 = arith.constant 0 : index
      %c0_50 = arith.constant 0 : index
      %64 = vector.load %arg11[%c0_49, %c0_50] : memref<2x1xf32, #tpu.memory_space<vmem>>, vector<2x1xf32>
      tpu.vector_store %arg11[%c0_49, %c0_50], %63 {strides = array<i32>} : memref<2x1xf32, #tpu.memory_space<vmem>>, vector<2x1xf32>,
      %cst_51 = arith.constant 0.000000e+00 : f32
      %65 = vector.broadcast %cst_51 : f32 to vector<2x1xf32>
      %c0_52 = arith.constant 0 : index
      %c0_53 = arith.constant 0 : index
      %66 = vector.load %arg12[%c0_52, %c0_53] : memref<2x1xf32, #tpu.memory_space<vmem>>, vector<2x1xf32>
      tpu.vector_store %arg12[%c0_52, %c0_53], %65 {strides = array<i32>} : memref<2x1xf32, #tpu.memory_space<vmem>>, vector<2x1xf32>,
    } else {
    }
    %c0 = arith.constant 0 : index
    %c0_1 = arith.constant 0 : index
    %3 = vector.load %arg2[%c0, %c0_1] : memref<2x32xbf16, #tpu.memory_space<vmem>>, vector<2x32xbf16>
    %c0_2 = arith.constant 0 : index
    %c0_3 = arith.constant 0 : index
    %4 = vector.load %arg3[%c0_2, %c0_3] : memref<2x32xbf16, #tpu.memory_space<vmem>>, vector<2x32xbf16>
    %c0_4 = arith.constant 0 : index
    %c0_5 = arith.constant 0 : index
    %5 = vector.load %arg4[%c0_4, %c0_5] : memref<2x32xbf16, #tpu.memory_space<vmem>>, vector<2x32xbf16>
    %c0_6 = arith.constant 0 : index
    %c0_7 = arith.constant 0 : index
    %6 = vector.load %arg5[%c0_6, %c0_7] : memref<2x32xbf16, #tpu.memory_space<vmem>>, vector<2x32xbf16>
    %c0_8 = arith.constant 0 : index
    %c0_9 = arith.constant 0 : index
    %7 = vector.load %arg6[%c0_8, %c0_9] : memref<2x1xi32, #tpu.memory_space<vmem>>, vector<2x1xi32>
    %c0_10 = arith.constant 0 : index
    %c0_11 = arith.constant 0 : index
    %8 = vector.load %arg7[%c0_10, %c0_11] : memref<1x2xi32, #tpu.memory_space<vmem>>, vector<1x2xi32>
    %9 = vector.broadcast %7 : vector<2x1xi32> to vector<2x2xi32>
    %10 = vector.broadcast %8 : vector<1x2xi32> to vector<2x2xi32>
    %11 = arith.cmpi eq, %9, %10 : vector<2x2xi32>
    %cst_12 = arith.constant dense<0.000000e+00> : vector<2x2xf32>
    %12 = tpu.matmul %3, %6, %cst_12 {dimension_numbers = #tpu.dot_dimension_numbers<[1], [1], [0], [0], [0, 0, 1, 0], [], []>} : vector<2x32xbf16>, vector<2x32xbf16>, vector<2x2xf32> -> vector<2x2xf32>
    %cst_13 = arith.constant -1.000000e+30 : f32
    %13 = vector.broadcast %cst_13 : f32 to vector<2x2xf32>
    %14 = arith.select %11, %12, %13 : vector<2x2xi1>, vector<2x2xf32>
    %c0_14 = arith.constant 0 : index
    %c0_15 = arith.constant 0 : index
    %15 = vector.load %arg9[%c0_14, %c0_15] : memref<2x1xf32, #tpu.memory_space<vmem>>, vector<2x1xf32>
    %cst_16 = arith.constant dense<0xFF800000> : vector<2xf32>
    %16 = vector.multi_reduction <maximumf>, %14, %cst_16 [1] : vector<2x2xf32> to vector<2xf32>
    %17 = vector.shape_cast %16 : vector<2xf32> to vector<2x1xf32>
    %18 = arith.maximumf %15, %17 : vector<2x1xf32>
    %19 = vector.broadcast %18 : vector<2x1xf32> to vector<2x2xf32>
    %20 = arith.subf %14, %19 : vector<2x2xf32>
    %21 = math.exp %20 : vector<2x2xf32>
    %cst_17 = arith.constant 0.000000e+00 : f32
    %22 = vector.broadcast %cst_17 : f32 to vector<2x2xf32>
    %23 = arith.select %11, %21, %22 : vector<2x2xi1>, vector<2x2xf32>
    %c0_18 = arith.constant 0 : index
    %c0_19 = arith.constant 0 : index
    %24 = vector.load %arg10[%c0_18, %c0_19] : memref<2x1xf32, #tpu.memory_space<vmem>>, vector<2x1xf32>
    %c0_20 = arith.constant 0 : index
    %c0_21 = arith.constant 0 : index
    %25 = vector.load %arg9[%c0_20, %c0_21] : memref<2x1xf32, #tpu.memory_space<vmem>>, vector<2x1xf32>
    %26 = arith.subf %25, %18 : vector<2x1xf32>
    %27 = math.exp %26 : vector<2x1xf32>
    %28 = arith.mulf %24, %27 : vector<2x1xf32>
    %cst_22 = arith.constant dense<0.000000e+00> : vector<2xf32>
    %29 = vector.multi_reduction <add>, %23, %cst_22 [1] : vector<2x2xf32> to vector<2xf32>
    %30 = vector.shape_cast %29 : vector<2xf32> to vector<2x1xf32>
    %31 = arith.addf %28, %30 : vector<2x1xf32>
    %c0_23 = arith.constant 0 : index
    %c0_24 = arith.constant 0 : index
    %32 = vector.load %arg10[%c0_23, %c0_24] : memref<2x1xf32, #tpu.memory_space<vmem>>, vector<2x1xf32>
    tpu.vector_store %arg10[%c0_23, %c0_24], %31 {strides = array<i32>} : memref<2x1xf32, #tpu.memory_space<vmem>>, vector<2x1xf32>,
    %c0_25 = arith.constant 0 : index
    %c0_26 = arith.constant 0 : index
    %33 = vector.load %arg9[%c0_25, %c0_26] : memref<2x1xf32, #tpu.memory_space<vmem>>, vector<2x1xf32>
    tpu.vector_store %arg9[%c0_25, %c0_26], %18 {strides = array<i32>} : memref<2x1xf32, #tpu.memory_space<vmem>>, vector<2x1xf32>,
    %cst_27 = arith.constant dense<0.000000e+00> : vector<2x2xf32>
    %34 = tpu.matmul %4, %5, %cst_27 {dimension_numbers = #tpu.dot_dimension_numbers<[1], [1], [0], [0], [0, 0, 1, 0], [], []>} : vector<2x32xbf16>, vector<2x32xbf16>, vector<2x2xf32> -> vector<2x2xf32>
    %cst_28 = arith.constant -1.000000e+30 : f32
    %35 = vector.broadcast %cst_28 : f32 to vector<2x2xf32>
    %36 = arith.select %11, %34, %35 : vector<2x2xi1>, vector<2x2xf32>
    %c0_29 = arith.constant 0 : index
    %c0_30 = arith.constant 0 : index
    %37 = vector.load %arg11[%c0_29, %c0_30] : memref<2x1xf32, #tpu.memory_space<vmem>>, vector<2x1xf32>
    %cst_31 = arith.constant dense<0xFF800000> : vector<2xf32>
    %38 = vector.multi_reduction <maximumf>, %36, %cst_31 [1] : vector<2x2xf32> to vector<2xf32>
    %39 = vector.shape_cast %38 : vector<2xf32> to vector<2x1xf32>
    %40 = arith.maximumf %37, %39 : vector<2x1xf32>
    %41 = vector.broadcast %40 : vector<2x1xf32> to vector<2x2xf32>
    %42 = arith.subf %36, %41 : vector<2x2xf32>
    %43 = math.exp %42 : vector<2x2xf32>
    %cst_32 = arith.constant 0.000000e+00 : f32
    %44 = vector.broadcast %cst_32 : f32 to vector<2x2xf32>
    %45 = arith.select %11, %43, %44 : vector<2x2xi1>, vector<2x2xf32>
    %c0_33 = arith.constant 0 : index
    %c0_34 = arith.constant 0 : index
    %46 = vector.load %arg12[%c0_33, %c0_34] : memref<2x1xf32, #tpu.memory_space<vmem>>, vector<2x1xf32>
    %c0_35 = arith.constant 0 : index
    %c0_36 = arith.constant 0 : index
    %47 = vector.load %arg11[%c0_35, %c0_36] : memref<2x1xf32, #tpu.memory_space<vmem>>, vector<2x1xf32>
    %48 = arith.subf %47, %40 : vector<2x1xf32>
    %49 = math.exp %48 : vector<2x1xf32>
    %50 = arith.mulf %46, %49 : vector<2x1xf32>
    %cst_37 = arith.constant dense<0.000000e+00> : vector<2xf32>
    %51 = vector.multi_reduction <add>, %45, %cst_37 [1] : vector<2x2xf32> to vector<2xf32>
    %52 = vector.shape_cast %51 : vector<2xf32> to vector<2x1xf32>
    %53 = arith.addf %50, %52 : vector<2x1xf32>
    %c0_38 = arith.constant 0 : index
    %c0_39 = arith.constant 0 : index
    %54 = vector.load %arg12[%c0_38, %c0_39] : memref<2x1xf32, #tpu.memory_space<vmem>>, vector<2x1xf32>
    tpu.vector_store %arg12[%c0_38, %c0_39], %53 {strides = array<i32>} : memref<2x1xf32, #tpu.memory_space<vmem>>, vector<2x1xf32>,
    %c0_40 = arith.constant 0 : index
    %c0_41 = arith.constant 0 : index
    %55 = vector.load %arg11[%c0_40, %c0_41] : memref<2x1xf32, #tpu.memory_space<vmem>>, vector<2x1xf32>
    tpu.vector_store %arg11[%c0_40, %c0_41], %40 {strides = array<i32>} : memref<2x1xf32, #tpu.memory_space<vmem>>, vector<2x1xf32>,
    %c0_i32_42 = arith.constant 0 : i32
    %56 = arith.cmpi eq, %arg1, %c0_i32_42 : i32
    %57 = arith.extui %56 : i1 to i32
    %c0_i32_43 = arith.constant 0 : i32
    %58 = arith.cmpi ne, %57, %c0_i32_43 : i32
    scf.if %58 {
      %59 = arith.extf %3 : vector<2x32xbf16> to vector<2x32xf32>
      %60 = arith.extf %4 : vector<2x32xbf16> to vector<2x32xf32>
      %61 = arith.mulf %59, %60 : vector<2x32xf32>
      %cst_44 = arith.constant dense<0.000000e+00> : vector<2xf32>
      %62 = vector.multi_reduction <add>, %61, %cst_44 [1] : vector<2x32xf32> to vector<2xf32>
      %63 = vector.shape_cast %62 : vector<2xf32> to vector<2x1xf32>
      %c0_i32_45 = arith.constant 0 : i32
      %64 = vector.broadcast %c0_i32_45 : i32 to vector<2x1xi32>
      %65 = arith.cmpi sge, %7, %64 : vector<2x1xi32>
      %66 = arith.extui %65 : vector<2x1xi1> to vector<2x1xi32>
      %67 = arith.sitofp %66 : vector<2x1xi32> to vector<2x1xf32>
      %c0_46 = arith.constant 0 : index
      %c0_47 = arith.constant 0 : index
      %68 = vector.load %arg9[%c0_46, %c0_47] : memref<2x1xf32, #tpu.memory_space<vmem>>, vector<2x1xf32>
      %c0_48 = arith.constant 0 : index
      %c0_49 = arith.constant 0 : index
      %69 = vector.load %arg10[%c0_48, %c0_49] : memref<2x1xf32, #tpu.memory_space<vmem>>, vector<2x1xf32>
      %cst_50 = arith.constant 1.000000e-30 : f32
      %70 = vector.broadcast %cst_50 : f32 to vector<2x1xf32>
      %71 = arith.maximumf %69, %70 : vector<2x1xf32>
      %72 = math.log %71 : vector<2x1xf32>
      %73 = arith.addf %68, %72 : vector<2x1xf32>
      %74 = arith.subf %63, %73 : vector<2x1xf32>
      %75 = arith.mulf %67, %74 : vector<2x1xf32>
      %76 = vector.shape_cast %75 : vector<2x1xf32> to vector<1x2x1xf32>
      %cst_51 = arith.constant dense<0.000000e+00> : vector<1xf32>
      %77 = vector.multi_reduction <add>, %76, %cst_51 [1, 2] : vector<1x2x1xf32> to vector<1xf32>
      %78 = vector.shape_cast %77 : vector<1xf32> to vector<1x1x1xf32>
      %79 = vector.extract %78[0, 0, 0] : f32 from vector<1x1x1xf32>
      %cst_52 = arith.constant 0.000000e+00 : f32
      %80 = arith.subf %cst_52, %79 : f32
      %c0_53 = arith.constant 0 : index
      %c0_54 = arith.constant 0 : index
      %81 = vector.load %arg11[%c0_53, %c0_54] : memref<2x1xf32, #tpu.memory_space<vmem>>, vector<2x1xf32>
      %c0_55 = arith.constant 0 : index
      %c0_56 = arith.constant 0 : index
      %82 = vector.load %arg12[%c0_55, %c0_56] : memref<2x1xf32, #tpu.memory_space<vmem>>, vector<2x1xf32>
      %cst_57 = arith.constant 1.000000e-30 : f32
      %83 = vector.broadcast %cst_57 : f32 to vector<2x1xf32>
      %84 = arith.maximumf %82, %83 : vector<2x1xf32>
      %85 = math.log %84 : vector<2x1xf32>
      %86 = arith.addf %81, %85 : vector<2x1xf32>
      %87 = arith.subf %63, %86 : vector<2x1xf32>
      %88 = arith.mulf %67, %87 : vector<2x1xf32>
      %89 = vector.shape_cast %88 : vector<2x1xf32> to vector<1x2x1xf32>
      %cst_58 = arith.constant dense<0.000000e+00> : vector<1xf32>
      %90 = vector.multi_reduction <add>, %89, %cst_58 [1, 2] : vector<1x2x1xf32> to vector<1xf32>
      %91 = vector.shape_cast %90 : vector<1xf32> to vector<1x1x1xf32>
      %92 = vector.extract %91[0, 0, 0] : f32 from vector<1x1x1xf32>
      %cst_59 = arith.constant 0.000000e+00 : f32
      %93 = arith.subf %cst_59, %92 : f32
      %94 = tpu.iota {dimensions = array<i32: 2>} : vector<1x1x128xi32>
      %c0_i32_60 = arith.constant 0 : i32
      %95 = vector.broadcast %c0_i32_60 : i32 to vector<1x1x128xi32>
      %96 = arith.cmpi eq, %94, %95 : vector<1x1x128xi32>
      %c1_i32 = arith.constant 1 : i32
      %97 = vector.broadcast %c1_i32 : i32 to vector<1x1x128xi32>
      %98 = arith.cmpi eq, %94, %97 : vector<1x1x128xi32>
      %cst_61 = arith.constant 0.000000e+00 : f32
      %99 = vector.broadcast %93 : f32 to vector<1x1x128xf32>
      %100 = vector.broadcast %cst_61 : f32 to vector<1x1x128xf32>
      %101 = arith.select %98, %99, %100 : vector<1x1x128xi1>, vector<1x1x128xf32>
      %102 = vector.broadcast %80 : f32 to vector<1x1x128xf32>
      %103 = arith.select %96, %102, %101 : vector<1x1x128xi1>, vector<1x1x128xf32>
      %c0_62 = arith.constant 0 : index
      %c0_63 = arith.constant 0 : index
      %c0_64 = arith.constant 0 : index
      %104 = vector.load %arg8[%c0_62, %c0_63, %c0_64] : memref<1x1x128xf32, #tpu.memory_space<vmem>>, vector<1x1x128xf32>
      tpu.vector_store %arg8[%c0_62, %c0_63, %c0_64], %103 {strides = array<i32>} : memref<1x1x128xf32, #tpu.memory_space<vmem>>, vector<1x1x128xf32>,
    } else {
    }
    return
  }
  func.func @transform_0(%arg0: i32, %arg1: i32) -> (i32, i32) {
    %c0_i32 = arith.constant 0 : i32
    %c0_i32_0 = arith.constant 0 : i32
    return %arg0, %c0_i32 : i32, i32
  }
  func.func @transform_1(%arg0: i32, %arg1: i32) -> (i32, i32) {
    %c0_i32 = arith.constant 0 : i32
    %c0_i32_0 = arith.constant 0 : i32
    return %arg0, %c0_i32 : i32, i32
  }
  func.func @transform_2(%arg0: i32, %arg1: i32) -> (i32, i32) {
    %c0_i32 = arith.constant 0 : i32
    %c0_i32_0 = arith.constant 0 : i32
    return %arg1, %c0_i32 : i32, i32
  }
  func.func @transform_3(%arg0: i32, %arg1: i32) -> (i32, i32) {
    %c0_i32 = arith.constant 0 : i32
    %c0_i32_0 = arith.constant 0 : i32
    return %arg1, %c0_i32 : i32, i32
  }
  func.func @transform_4(%arg0: i32, %arg1: i32) -> (i32, i32) {
    %c0_i32 = arith.constant 0 : i32
    %c0_i32_0 = arith.constant 0 : i32
    return %arg0, %c0_i32 : i32, i32
  }
  func.func @transform_5(%arg0: i32, %arg1: i32) -> (i32, i32) {
    %c0_i32 = arith.constant 0 : i32
    %c0_i32_0 = arith.constant 0 : i32
    return %c0_i32, %arg1 : i32, i32
  }
  func.func @transform_6(%arg0: i32, %arg1: i32) -> (i32, i32, i32) {
    %c0_i32 = arith.constant 0 : i32
    %c0_i32_0 = arith.constant 0 : i32
    %c0_i32_1 = arith.constant 0 : i32
    return %arg0, %c0_i32, %c0_i32_0 : i32, i32, i32
  }
}

module attributes {stable_mosaic.version = 11 : i64} {
  func.func @_masked_pool_kernel(%arg0: i32, %arg1: i32, %arg2: memref<2x16x32xf32, #tpu.memory_space<vmem>>, %arg3: memref<2x1x16xf32, #tpu.memory_space<vmem>>, %arg4: memref<2x32xf32, #tpu.memory_space<vmem>>, %arg5: memref<2x32xf32, #tpu.memory_space<vmem>>, %arg6: memref<2x1xf32, #tpu.memory_space<vmem>>) attributes {dimension_semantics = [#tpu.dimension_semantics<parallel>, #tpu.dimension_semantics<arbitrary>], iteration_bounds = array<i64: 1, 1>, scalar_prefetch = 0 : i64, scratch_operands = 2 : i64, tpu.core_type = #tpu.core_type<tc>, window_params = [{transform_indices = @transform_0, window_bounds = array<i64: 2, 16, 32>}, {transform_indices = @transform_1, window_bounds = array<i64: 2, 1, 16>}, {transform_indices = @transform_2, window_bounds = array<i64: 2, 32>}]} {
    %c0_i32 = arith.constant 0 : i32
    %0 = arith.cmpi eq, %arg1, %c0_i32 : i32
    %1 = arith.extui %0 : i1 to i32
    %c0_i32_0 = arith.constant 0 : i32
    %2 = arith.cmpi ne, %1, %c0_i32_0 : i32
    scf.if %2 {
      %cst_17 = arith.constant 0.000000e+00 : f32
      %17 = vector.broadcast %cst_17 : f32 to vector<2x32xf32>
      %c0_18 = arith.constant 0 : index
      %c0_19 = arith.constant 0 : index
      %18 = vector.load %arg5[%c0_18, %c0_19] : memref<2x32xf32, #tpu.memory_space<vmem>>, vector<2x32xf32>
      tpu.vector_store %arg5[%c0_18, %c0_19], %17 {strides = array<i32>} : memref<2x32xf32, #tpu.memory_space<vmem>>, vector<2x32xf32>,
      %cst_20 = arith.constant 0.000000e+00 : f32
      %19 = vector.broadcast %cst_20 : f32 to vector<2x1xf32>
      %c0_21 = arith.constant 0 : index
      %c0_22 = arith.constant 0 : index
      %20 = vector.load %arg6[%c0_21, %c0_22] : memref<2x1xf32, #tpu.memory_space<vmem>>, vector<2x1xf32>
      tpu.vector_store %arg6[%c0_21, %c0_22], %19 {strides = array<i32>} : memref<2x1xf32, #tpu.memory_space<vmem>>, vector<2x1xf32>,
    } else {
    }
    %c0 = arith.constant 0 : index
    %c0_1 = arith.constant 0 : index
    %c0_2 = arith.constant 0 : index
    %3 = vector.load %arg2[%c0, %c0_1, %c0_2] : memref<2x16x32xf32, #tpu.memory_space<vmem>>, vector<2x16x32xf32>
    %c0_3 = arith.constant 0 : index
    %c0_4 = arith.constant 0 : index
    %c0_5 = arith.constant 0 : index
    %4 = vector.load %arg3[%c0_3, %c0_4, %c0_5] : memref<2x1x16xf32, #tpu.memory_space<vmem>>, vector<2x1x16xf32>
    %c0_6 = arith.constant 0 : index
    %c0_7 = arith.constant 0 : index
    %5 = vector.load %arg5[%c0_6, %c0_7] : memref<2x32xf32, #tpu.memory_space<vmem>>, vector<2x32xf32>
    "tpu.trace_start"() <{level = 10 : i32, message = "bkn,bnd->bkd"}> : () -> ()
    %cst = arith.constant dense<0.000000e+00> : vector<2x1x32xf32>
    %6 = tpu.matmul %4, %3, %cst {dimension_numbers = #tpu.dot_dimension_numbers<[2], [1], [1], [2], [0, 0, 0, 1, 1, 2], [0], [0]>} : vector<2x1x16xf32>, vector<2x16x32xf32>, vector<2x1x32xf32> -> vector<2x1x32xf32>
    "tpu.trace_stop"() : () -> ()
    %7 = vector.shape_cast %6 : vector<2x1x32xf32> to vector<2x32xf32>
    %8 = arith.addf %5, %7 : vector<2x32xf32>
    %c0_8 = arith.constant 0 : index
    %c0_9 = arith.constant 0 : index
    %9 = vector.load %arg5[%c0_8, %c0_9] : memref<2x32xf32, #tpu.memory_space<vmem>>, vector<2x32xf32>
    tpu.vector_store %arg5[%c0_8, %c0_9], %8 {strides = array<i32>} : memref<2x32xf32, #tpu.memory_space<vmem>>, vector<2x32xf32>,
    %c0_10 = arith.constant 0 : index
    %c0_11 = arith.constant 0 : index
    %10 = vector.load %arg6[%c0_10, %c0_11] : memref<2x1xf32, #tpu.memory_space<vmem>>, vector<2x1xf32>
    %cst_12 = arith.constant dense<0.000000e+00> : vector<2x1xf32>
    %11 = vector.multi_reduction <add>, %4, %cst_12 [2] : vector<2x1x16xf32> to vector<2x1xf32>
    %12 = arith.addf %10, %11 : vector<2x1xf32>
    %c0_13 = arith.constant 0 : index
    %c0_14 = arith.constant 0 : index
    %13 = vector.load %arg6[%c0_13, %c0_14] : memref<2x1xf32, #tpu.memory_space<vmem>>, vector<2x1xf32>
    tpu.vector_store %arg6[%c0_13, %c0_14], %12 {strides = array<i32>} : memref<2x1xf32, #tpu.memory_space<vmem>>, vector<2x1xf32>,
    %c0_i32_15 = arith.constant 0 : i32
    %14 = arith.cmpi eq, %arg1, %c0_i32_15 : i32
    %15 = arith.extui %14 : i1 to i32
    %c0_i32_16 = arith.constant 0 : i32
    %16 = arith.cmpi ne, %15, %c0_i32_16 : i32
    scf.if %16 {
      %c0_17 = arith.constant 0 : index
      %c0_18 = arith.constant 0 : index
      %17 = vector.load %arg5[%c0_17, %c0_18] : memref<2x32xf32, #tpu.memory_space<vmem>>, vector<2x32xf32>
      %c0_19 = arith.constant 0 : index
      %c0_20 = arith.constant 0 : index
      %18 = vector.load %arg6[%c0_19, %c0_20] : memref<2x1xf32, #tpu.memory_space<vmem>>, vector<2x1xf32>
      %cst_21 = arith.constant 1.000000e+00 : f32
      %19 = vector.broadcast %cst_21 : f32 to vector<2x1xf32>
      %20 = arith.maximumf %18, %19 : vector<2x1xf32>
      %21 = vector.broadcast %20 : vector<2x1xf32> to vector<2x32xf32>
      %22 = arith.divf %17, %21 : vector<2x32xf32>
      %c0_22 = arith.constant 0 : index
      %c0_23 = arith.constant 0 : index
      %23 = vector.load %arg4[%c0_22, %c0_23] : memref<2x32xf32, #tpu.memory_space<vmem>>, vector<2x32xf32>
      tpu.vector_store %arg4[%c0_22, %c0_23], %22 {strides = array<i32>} : memref<2x32xf32, #tpu.memory_space<vmem>>, vector<2x32xf32>,
    } else {
    }
    return
  }
  func.func @transform_0(%arg0: i32, %arg1: i32) -> (i32, i32, i32) {
    %c0_i32 = arith.constant 0 : i32
    %c0_i32_0 = arith.constant 0 : i32
    return %arg0, %arg1, %c0_i32 : i32, i32, i32
  }
  func.func @transform_1(%arg0: i32, %arg1: i32) -> (i32, i32, i32) {
    %c0_i32 = arith.constant 0 : i32
    %c0_i32_0 = arith.constant 0 : i32
    return %arg0, %c0_i32, %arg1 : i32, i32, i32
  }
  func.func @transform_2(%arg0: i32, %arg1: i32) -> (i32, i32) {
    %c0_i32 = arith.constant 0 : i32
    %c0_i32_0 = arith.constant 0 : i32
    return %arg0, %c0_i32 : i32, i32
  }
}

module attributes {stable_mosaic.version = 11 : i64} {
  func.func @_cross_attn_kernel(%arg0: i32, %arg1: memref<1x8x32xf32, #tpu.memory_space<vmem>>, %arg2: memref<1x16x32xf32, #tpu.memory_space<vmem>>, %arg3: memref<32x32xf32, #tpu.memory_space<vmem>>, %arg4: memref<1x8x32xf32, #tpu.memory_space<vmem>>) attributes {dimension_semantics = [#tpu.dimension_semantics<parallel>], iteration_bounds = array<i64: 2>, scalar_prefetch = 0 : i64, scratch_operands = 0 : i64, tpu.core_type = #tpu.core_type<tc>, window_params = [{transform_indices = @transform_0, window_bounds = array<i64: 1, 8, 32>}, {transform_indices = @transform_1, window_bounds = array<i64: 1, 16, 32>}, {pipeline_mode = #tpu.pipeline_mode<synchronous>, transform_indices = @transform_2, window_bounds = array<i64: 32, 32>}, {transform_indices = @transform_3, window_bounds = array<i64: 1, 8, 32>}]} {
    %c0 = arith.constant 0 : index
    %c0_0 = arith.constant 0 : index
    %c0_1 = arith.constant 0 : index
    %0 = vector.load %arg1[%c0, %c0_0, %c0_1] : memref<1x8x32xf32, #tpu.memory_space<vmem>>, vector<1x8x32xf32>
    %cst = arith.constant 0.176776692 : f32
    %1 = vector.broadcast %cst : f32 to vector<1x8x32xf32>
    %2 = arith.mulf %0, %1 : vector<1x8x32xf32>
    %3 = arith.truncf %2 : vector<1x8x32xf32> to vector<1x8x32xbf16>
    %c0_2 = arith.constant 0 : index
    %c0_3 = arith.constant 0 : index
    %c0_4 = arith.constant 0 : index
    %4 = vector.load %arg2[%c0_2, %c0_3, %c0_4] : memref<1x16x32xf32, #tpu.memory_space<vmem>>, vector<1x16x32xf32>
    %5 = arith.truncf %4 : vector<1x16x32xf32> to vector<1x16x32xbf16>
    "tpu.trace_start"() <{level = 10 : i32, message = "bsd,bpd->bsp"}> : () -> ()
    %cst_5 = arith.constant dense<0.000000e+00> : vector<1x8x16xf32>
    %6 = tpu.matmul %3, %5, %cst_5 {dimension_numbers = #tpu.dot_dimension_numbers<[2], [2], [1], [1], [0, 0, 0, 1, 1, 1], [0], [0]>} : vector<1x8x32xbf16>, vector<1x16x32xbf16>, vector<1x8x16xf32> -> vector<1x8x16xf32>
    "tpu.trace_stop"() : () -> ()
    %cst_6 = arith.constant dense<0xFF800000> : vector<1x8xf32>
    %7 = vector.multi_reduction <maximumf>, %6, %cst_6 [2] : vector<1x8x16xf32> to vector<1x8xf32>
    %8 = vector.shape_cast %7 : vector<1x8xf32> to vector<1x8x1xf32>
    %9 = vector.broadcast %8 : vector<1x8x1xf32> to vector<1x8x16xf32>
    %10 = arith.subf %6, %9 : vector<1x8x16xf32>
    %11 = math.exp %10 : vector<1x8x16xf32>
    %cst_7 = arith.constant dense<0.000000e+00> : vector<1x8xf32>
    %12 = vector.multi_reduction <add>, %11, %cst_7 [2] : vector<1x8x16xf32> to vector<1x8xf32>
    %13 = vector.shape_cast %12 : vector<1x8xf32> to vector<1x8x1xf32>
    %14 = arith.truncf %11 : vector<1x8x16xf32> to vector<1x8x16xbf16>
    "tpu.trace_start"() <{level = 10 : i32, message = "bsp,bpd->bsd"}> : () -> ()
    %cst_8 = arith.constant dense<0.000000e+00> : vector<1x8x32xf32>
    %15 = tpu.matmul %14, %5, %cst_8 {dimension_numbers = #tpu.dot_dimension_numbers<[2], [1], [1], [2], [0, 0, 0, 1, 1, 2], [0], [0]>} : vector<1x8x16xbf16>, vector<1x16x32xbf16>, vector<1x8x32xf32> -> vector<1x8x32xf32>
    "tpu.trace_stop"() : () -> ()
    %16 = vector.broadcast %13 : vector<1x8x1xf32> to vector<1x8x32xf32>
    %17 = arith.divf %15, %16 : vector<1x8x32xf32>
    %c0_9 = arith.constant 0 : index
    %c0_10 = arith.constant 0 : index
    %18 = vector.load %arg3[%c0_9, %c0_10] : memref<32x32xf32, #tpu.memory_space<vmem>>, vector<32x32xf32>
    %19 = arith.truncf %18 : vector<32x32xf32> to vector<32x32xbf16>
    %20 = vector.shape_cast %17 : vector<1x8x32xf32> to vector<8x32xf32>
    %21 = arith.truncf %20 : vector<8x32xf32> to vector<8x32xbf16>
    %cst_11 = arith.constant dense<0.000000e+00> : vector<8x32xf32>
    %22 = tpu.matmul %21, %19, %cst_11 {dimension_numbers = #tpu.dot_dimension_numbers<[1], [0], [0], [1], [0, 0, 1, 1], [], []>} : vector<8x32xbf16>, vector<32x32xbf16>, vector<8x32xf32> -> vector<8x32xf32>
    %23 = vector.shape_cast %22 : vector<8x32xf32> to vector<1x8x32xf32>
    %c0_12 = arith.constant 0 : index
    %c0_13 = arith.constant 0 : index
    %c0_14 = arith.constant 0 : index
    %24 = vector.load %arg4[%c0_12, %c0_13, %c0_14] : memref<1x8x32xf32, #tpu.memory_space<vmem>>, vector<1x8x32xf32>
    tpu.vector_store %arg4[%c0_12, %c0_13, %c0_14], %23 {strides = array<i32>} : memref<1x8x32xf32, #tpu.memory_space<vmem>>, vector<1x8x32xf32>,
    return
  }
  func.func @transform_0(%arg0: i32) -> (i32, i32, i32) {
    %c0_i32 = arith.constant 0 : i32
    %c0_i32_0 = arith.constant 0 : i32
    %c0_i32_1 = arith.constant 0 : i32
    return %arg0, %c0_i32, %c0_i32_0 : i32, i32, i32
  }
  func.func @transform_1(%arg0: i32) -> (i32, i32, i32) {
    %c0_i32 = arith.constant 0 : i32
    %c0_i32_0 = arith.constant 0 : i32
    %c0_i32_1 = arith.constant 0 : i32
    return %arg0, %c0_i32, %c0_i32_0 : i32, i32, i32
  }
  func.func @transform_2(%arg0: i32) -> (i32, i32) {
    %c0_i32 = arith.constant 0 : i32
    %c0_i32_0 = arith.constant 0 : i32
    %c0_i32_1 = arith.constant 0 : i32
    return %c0_i32, %c0_i32_0 : i32, i32
  }
  func.func @transform_3(%arg0: i32) -> (i32, i32, i32) {
    %c0_i32 = arith.constant 0 : i32
    %c0_i32_0 = arith.constant 0 : i32
    %c0_i32_1 = arith.constant 0 : i32
    return %arg0, %c0_i32, %c0_i32_0 : i32, i32, i32
  }
}

module attributes {stable_mosaic.version = 11 : i64} {
  func.func @_pair_prep_kernel(%arg0: i32, %arg1: memref<16x32xf32, #tpu.memory_space<vmem>>, %arg2: memref<16x32xf32, #tpu.memory_space<vmem>>, %arg3: memref<16x1xi32, #tpu.memory_space<vmem>>, %arg4: memref<16x32xbf16, #tpu.memory_space<vmem>>, %arg5: memref<16x32xbf16, #tpu.memory_space<vmem>>, %arg6: memref<1x1x128xf32, #tpu.memory_space<vmem>>) attributes {dimension_semantics = [#tpu.dimension_semantics<parallel>], iteration_bounds = array<i64: 1>, scalar_prefetch = 0 : i64, scratch_operands = 0 : i64, tpu.core_type = #tpu.core_type<tc>, window_params = [{transform_indices = @transform_0, window_bounds = array<i64: 16, 32>}, {transform_indices = @transform_1, window_bounds = array<i64: 16, 32>}, {transform_indices = @transform_2, window_bounds = array<i64: 16, 1>}, {transform_indices = @transform_3, window_bounds = array<i64: 16, 32>}, {transform_indices = @transform_4, window_bounds = array<i64: 16, 32>}, {transform_indices = @transform_5, window_bounds = array<i64: 1, 1, 128>}]} {
    %c0 = arith.constant 0 : index
    %c0_0 = arith.constant 0 : index
    %0 = vector.load %arg1[%c0, %c0_0] : memref<16x32xf32, #tpu.memory_space<vmem>>, vector<16x32xf32>
    %c0_1 = arith.constant 0 : index
    %c0_2 = arith.constant 0 : index
    %1 = vector.load %arg2[%c0_1, %c0_2] : memref<16x32xf32, #tpu.memory_space<vmem>>, vector<16x32xf32>
    %2 = arith.mulf %0, %0 : vector<16x32xf32>
    %cst = arith.constant dense<0.000000e+00> : vector<16xf32>
    %3 = vector.multi_reduction <add>, %2, %cst [1] : vector<16x32xf32> to vector<16xf32>
    %4 = vector.shape_cast %3 : vector<16xf32> to vector<16x1xf32>
    %cst_3 = arith.constant 9.99999996E-13 : f32
    %5 = vector.broadcast %cst_3 : f32 to vector<16x1xf32>
    %6 = arith.addf %4, %5 : vector<16x1xf32>
    %7 = math.rsqrt %6 : vector<16x1xf32>
    %cst_4 = arith.constant 2.000000e+00 : f32
    %8 = vector.broadcast %cst_4 : f32 to vector<16x1xf32>
    %9 = arith.mulf %7, %8 : vector<16x1xf32>
    %10 = vector.broadcast %9 : vector<16x1xf32> to vector<16x32xf32>
    %11 = arith.mulf %0, %10 : vector<16x32xf32>
    %12 = arith.mulf %1, %1 : vector<16x32xf32>
    %cst_5 = arith.constant dense<0.000000e+00> : vector<16xf32>
    %13 = vector.multi_reduction <add>, %12, %cst_5 [1] : vector<16x32xf32> to vector<16xf32>
    %14 = vector.shape_cast %13 : vector<16xf32> to vector<16x1xf32>
    %cst_6 = arith.constant 9.99999996E-13 : f32
    %15 = vector.broadcast %cst_6 : f32 to vector<16x1xf32>
    %16 = arith.addf %14, %15 : vector<16x1xf32>
    %17 = math.rsqrt %16 : vector<16x1xf32>
    %cst_7 = arith.constant 2.000000e+00 : f32
    %18 = vector.broadcast %cst_7 : f32 to vector<16x1xf32>
    %19 = arith.mulf %17, %18 : vector<16x1xf32>
    %20 = vector.broadcast %19 : vector<16x1xf32> to vector<16x32xf32>
    %21 = arith.mulf %1, %20 : vector<16x32xf32>
    %22 = arith.truncf %11 : vector<16x32xf32> to vector<16x32xbf16>
    %c0_8 = arith.constant 0 : index
    %c0_9 = arith.constant 0 : index
    %23 = vector.load %arg4[%c0_8, %c0_9] : memref<16x32xbf16, #tpu.memory_space<vmem>>, vector<16x32xbf16>
    tpu.vector_store %arg4[%c0_8, %c0_9], %22 {strides = array<i32>} : memref<16x32xbf16, #tpu.memory_space<vmem>>, vector<16x32xbf16>,
    %24 = arith.truncf %21 : vector<16x32xf32> to vector<16x32xbf16>
    %c0_10 = arith.constant 0 : index
    %c0_11 = arith.constant 0 : index
    %25 = vector.load %arg5[%c0_10, %c0_11] : memref<16x32xbf16, #tpu.memory_space<vmem>>, vector<16x32xbf16>
    tpu.vector_store %arg5[%c0_10, %c0_11], %24 {strides = array<i32>} : memref<16x32xbf16, #tpu.memory_space<vmem>>, vector<16x32xbf16>,
    %c0_12 = arith.constant 0 : index
    %c0_13 = arith.constant 0 : index
    %26 = vector.load %arg3[%c0_12, %c0_13] : memref<16x1xi32, #tpu.memory_space<vmem>>, vector<16x1xi32>
    %c0_i32 = arith.constant 0 : i32
    %27 = vector.broadcast %c0_i32 : i32 to vector<16x1xi32>
    %28 = arith.cmpi sge, %26, %27 : vector<16x1xi32>
    %29 = arith.extui %28 : vector<16x1xi1> to vector<16x1xi32>
    %30 = arith.sitofp %29 : vector<16x1xi32> to vector<16x1xf32>
    %31 = arith.subf %0, %1 : vector<16x32xf32>
    %32 = arith.mulf %31, %31 : vector<16x32xf32>
    %cst_14 = arith.constant dense<0.000000e+00> : vector<16xf32>
    %33 = vector.multi_reduction <add>, %32, %cst_14 [1] : vector<16x32xf32> to vector<16xf32>
    %34 = vector.shape_cast %33 : vector<16xf32> to vector<16x1xf32>
    %35 = arith.mulf %30, %34 : vector<16x1xf32>
    %36 = vector.shape_cast %35 : vector<16x1xf32> to vector<1x16x1xf32>
    %cst_15 = arith.constant dense<0.000000e+00> : vector<1xf32>
    %37 = vector.multi_reduction <add>, %36, %cst_15 [1, 2] : vector<1x16x1xf32> to vector<1xf32>
    %38 = vector.shape_cast %37 : vector<1xf32> to vector<1x1x1xf32>
    %39 = vector.extract %38[0, 0, 0] : f32 from vector<1x1x1xf32>
    %40 = vector.shape_cast %30 : vector<16x1xf32> to vector<1x16x1xf32>
    %cst_16 = arith.constant dense<0.000000e+00> : vector<1xf32>
    %41 = vector.multi_reduction <add>, %40, %cst_16 [1, 2] : vector<1x16x1xf32> to vector<1xf32>
    %42 = vector.shape_cast %41 : vector<1xf32> to vector<1x1x1xf32>
    %43 = vector.extract %42[0, 0, 0] : f32 from vector<1x1x1xf32>
    %44 = tpu.iota {dimensions = array<i32: 2>} : vector<1x1x128xi32>
    %c0_i32_17 = arith.constant 0 : i32
    %45 = vector.broadcast %c0_i32_17 : i32 to vector<1x1x128xi32>
    %46 = arith.cmpi eq, %44, %45 : vector<1x1x128xi32>
    %c1_i32 = arith.constant 1 : i32
    %47 = vector.broadcast %c1_i32 : i32 to vector<1x1x128xi32>
    %48 = arith.cmpi eq, %44, %47 : vector<1x1x128xi32>
    %cst_18 = arith.constant 0.000000e+00 : f32
    %49 = vector.broadcast %43 : f32 to vector<1x1x128xf32>
    %50 = vector.broadcast %cst_18 : f32 to vector<1x1x128xf32>
    %51 = arith.select %48, %49, %50 : vector<1x1x128xi1>, vector<1x1x128xf32>
    %52 = vector.broadcast %39 : f32 to vector<1x1x128xf32>
    %53 = arith.select %46, %52, %51 : vector<1x1x128xi1>, vector<1x1x128xf32>
    %c0_19 = arith.constant 0 : index
    %c0_20 = arith.constant 0 : index
    %c0_21 = arith.constant 0 : index
    %54 = vector.load %arg6[%c0_19, %c0_20, %c0_21] : memref<1x1x128xf32, #tpu.memory_space<vmem>>, vector<1x1x128xf32>
    tpu.vector_store %arg6[%c0_19, %c0_20, %c0_21], %53 {strides = array<i32>} : memref<1x1x128xf32, #tpu.memory_space<vmem>>, vector<1x1x128xf32>,
    return
  }
  func.func @transform_0(%arg0: i32) -> (i32, i32) {
    %c0_i32 = arith.constant 0 : i32
    %c0_i32_0 = arith.constant 0 : i32
    return %arg0, %c0_i32 : i32, i32
  }
  func.func @transform_1(%arg0: i32) -> (i32, i32) {
    %c0_i32 = arith.constant 0 : i32
    %c0_i32_0 = arith.constant 0 : i32
    return %arg0, %c0_i32 : i32, i32
  }
  func.func @transform_2(%arg0: i32) -> (i32, i32) {
    %c0_i32 = arith.constant 0 : i32
    %c0_i32_0 = arith.constant 0 : i32
    return %arg0, %c0_i32 : i32, i32
  }
  func.func @transform_3(%arg0: i32) -> (i32, i32) {
    %c0_i32 = arith.constant 0 : i32
    %c0_i32_0 = arith.constant 0 : i32
    return %arg0, %c0_i32 : i32, i32
  }
  func.func @transform_4(%arg0: i32) -> (i32, i32) {
    %c0_i32 = arith.constant 0 : i32
    %c0_i32_0 = arith.constant 0 : i32
    return %arg0, %c0_i32 : i32, i32
  }
  func.func @transform_5(%arg0: i32) -> (i32, i32, i32) {
    %c0_i32 = arith.constant 0 : i32
    %c0_i32_0 = arith.constant 0 : i32
    %c0_i32_1 = arith.constant 0 : i32
    return %arg0, %c0_i32, %c0_i32_0 : i32, i32, i32
  }
}

module attributes {stable_mosaic.version = 11 : i64} {
  func.func @_pair_contr_kernel(%arg0: i32, %arg1: i32, %arg2: memref<16x32xbf16, #tpu.memory_space<vmem>>, %arg3: memref<16x32xbf16, #tpu.memory_space<vmem>>, %arg4: memref<16x32xbf16, #tpu.memory_space<vmem>>, %arg5: memref<16x32xbf16, #tpu.memory_space<vmem>>, %arg6: memref<16x1xi32, #tpu.memory_space<vmem>>, %arg7: memref<1x16xi32, #tpu.memory_space<vmem>>, %arg8: memref<1x1x128xf32, #tpu.memory_space<vmem>>, %arg9: memref<16x1xf32, #tpu.memory_space<vmem>>, %arg10: memref<16x1xf32, #tpu.memory_space<vmem>>, %arg11: memref<16x1xf32, #tpu.memory_space<vmem>>, %arg12: memref<16x1xf32, #tpu.memory_space<vmem>>) attributes {dimension_semantics = [#tpu.dimension_semantics<parallel>, #tpu.dimension_semantics<arbitrary>], iteration_bounds = array<i64: 1, 1>, scalar_prefetch = 0 : i64, scratch_operands = 4 : i64, tpu.core_type = #tpu.core_type<tc>, window_params = [{transform_indices = @transform_0, window_bounds = array<i64: 16, 32>}, {transform_indices = @transform_1, window_bounds = array<i64: 16, 32>}, {transform_indices = @transform_2, window_bounds = array<i64: 16, 32>}, {transform_indices = @transform_3, window_bounds = array<i64: 16, 32>}, {transform_indices = @transform_4, window_bounds = array<i64: 16, 1>}, {transform_indices = @transform_5, window_bounds = array<i64: 1, 16>}, {transform_indices = @transform_6, window_bounds = array<i64: 1, 1, 128>}]} {
    %c0_i32 = arith.constant 0 : i32
    %0 = arith.cmpi eq, %arg1, %c0_i32 : i32
    %1 = arith.extui %0 : i1 to i32
    %cst = arith.constant -1.000000e+30 : f32
    %c0_i32_0 = arith.constant 0 : i32
    %2 = arith.cmpi ne, %1, %c0_i32_0 : i32
    scf.if %2 {
      %36 = vector.broadcast %cst : f32 to vector<16x1xf32>
      %c0_27 = arith.constant 0 : index
      %c0_28 = arith.constant 0 : index
      %37 = vector.load %arg9[%c0_27, %c0_28] : memref<16x1xf32, #tpu.memory_space<vmem>>, vector<16x1xf32>
      tpu.vector_store %arg9[%c0_27, %c0_28], %36 {strides = array<i32>} : memref<16x1xf32, #tpu.memory_space<vmem>>, vector<16x1xf32>,
      %cst_29 = arith.constant 0.000000e+00 : f32
      %38 = vector.broadcast %cst_29 : f32 to vector<16x1xf32>
      %c0_30 = arith.constant 0 : index
      %c0_31 = arith.constant 0 : index
      %39 = vector.load %arg10[%c0_30, %c0_31] : memref<16x1xf32, #tpu.memory_space<vmem>>, vector<16x1xf32>
      tpu.vector_store %arg10[%c0_30, %c0_31], %38 {strides = array<i32>} : memref<16x1xf32, #tpu.memory_space<vmem>>, vector<16x1xf32>,
      %40 = vector.broadcast %cst : f32 to vector<16x1xf32>
      %c0_32 = arith.constant 0 : index
      %c0_33 = arith.constant 0 : index
      %41 = vector.load %arg11[%c0_32, %c0_33] : memref<16x1xf32, #tpu.memory_space<vmem>>, vector<16x1xf32>
      tpu.vector_store %arg11[%c0_32, %c0_33], %40 {strides = array<i32>} : memref<16x1xf32, #tpu.memory_space<vmem>>, vector<16x1xf32>,
      %cst_34 = arith.constant 0.000000e+00 : f32
      %42 = vector.broadcast %cst_34 : f32 to vector<16x1xf32>
      %c0_35 = arith.constant 0 : index
      %c0_36 = arith.constant 0 : index
      %43 = vector.load %arg12[%c0_35, %c0_36] : memref<16x1xf32, #tpu.memory_space<vmem>>, vector<16x1xf32>
      tpu.vector_store %arg12[%c0_35, %c0_36], %42 {strides = array<i32>} : memref<16x1xf32, #tpu.memory_space<vmem>>, vector<16x1xf32>,
    } else {
    }
    %c0 = arith.constant 0 : index
    %c0_1 = arith.constant 0 : index
    %3 = vector.load %arg2[%c0, %c0_1] : memref<16x32xbf16, #tpu.memory_space<vmem>>, vector<16x32xbf16>
    %c0_2 = arith.constant 0 : index
    %c0_3 = arith.constant 0 : index
    %4 = vector.load %arg3[%c0_2, %c0_3] : memref<16x32xbf16, #tpu.memory_space<vmem>>, vector<16x32xbf16>
    %c0_4 = arith.constant 0 : index
    %c0_5 = arith.constant 0 : index
    %5 = vector.load %arg4[%c0_4, %c0_5] : memref<16x32xbf16, #tpu.memory_space<vmem>>, vector<16x32xbf16>
    %c0_6 = arith.constant 0 : index
    %c0_7 = arith.constant 0 : index
    %6 = vector.load %arg6[%c0_6, %c0_7] : memref<16x1xi32, #tpu.memory_space<vmem>>, vector<16x1xi32>
    %c0_8 = arith.constant 0 : index
    %c0_9 = arith.constant 0 : index
    %7 = vector.load %arg7[%c0_8, %c0_9] : memref<1x16xi32, #tpu.memory_space<vmem>>, vector<1x16xi32>
    %8 = vector.broadcast %6 : vector<16x1xi32> to vector<16x16xi32>
    %9 = vector.broadcast %7 : vector<1x16xi32> to vector<16x16xi32>
    %10 = arith.cmpi eq, %8, %9 : vector<16x16xi32>
    %cst_10 = arith.constant dense<0.000000e+00> : vector<16x16xf32>
    %11 = tpu.matmul %4, %5, %cst_10 {dimension_numbers = #tpu.dot_dimension_numbers<[1], [1], [0], [0], [0, 0, 1, 0], [], []>} : vector<16x32xbf16>, vector<16x32xbf16>, vector<16x16xf32> -> vector<16x16xf32>
    %cst_11 = arith.constant -1.000000e+30 : f32
    %12 = vector.broadcast %cst_11 : f32 to vector<16x16xf32>
    %13 = arith.select %10, %11, %12 : vector<16x16xi1>, vector<16x16xf32>
    %c0_12 = arith.constant 0 : index
    %c0_13 = arith.constant 0 : index
    %14 = vector.load %arg11[%c0_12, %c0_13] : memref<16x1xf32, #tpu.memory_space<vmem>>, vector<16x1xf32>
    %cst_14 = arith.constant dense<0xFF800000> : vector<16xf32>
    %15 = vector.multi_reduction <maximumf>, %13, %cst_14 [1] : vector<16x16xf32> to vector<16xf32>
    %16 = vector.shape_cast %15 : vector<16xf32> to vector<16x1xf32>
    %17 = arith.maximumf %14, %16 : vector<16x1xf32>
    %18 = vector.broadcast %17 : vector<16x1xf32> to vector<16x16xf32>
    %19 = arith.subf %13, %18 : vector<16x16xf32>
    %20 = math.exp %19 : vector<16x16xf32>
    %cst_15 = arith.constant 0.000000e+00 : f32
    %21 = vector.broadcast %cst_15 : f32 to vector<16x16xf32>
    %22 = arith.select %10, %20, %21 : vector<16x16xi1>, vector<16x16xf32>
    %c0_16 = arith.constant 0 : index
    %c0_17 = arith.constant 0 : index
    %23 = vector.load %arg12[%c0_16, %c0_17] : memref<16x1xf32, #tpu.memory_space<vmem>>, vector<16x1xf32>
    %c0_18 = arith.constant 0 : index
    %c0_19 = arith.constant 0 : index
    %24 = vector.load %arg11[%c0_18, %c0_19] : memref<16x1xf32, #tpu.memory_space<vmem>>, vector<16x1xf32>
    %25 = arith.subf %24, %17 : vector<16x1xf32>
    %26 = math.exp %25 : vector<16x1xf32>
    %27 = arith.mulf %23, %26 : vector<16x1xf32>
    %cst_20 = arith.constant dense<0.000000e+00> : vector<16xf32>
    %28 = vector.multi_reduction <add>, %22, %cst_20 [1] : vector<16x16xf32> to vector<16xf32>
    %29 = vector.shape_cast %28 : vector<16xf32> to vector<16x1xf32>
    %30 = arith.addf %27, %29 : vector<16x1xf32>
    %c0_21 = arith.constant 0 : index
    %c0_22 = arith.constant 0 : index
    %31 = vector.load %arg12[%c0_21, %c0_22] : memref<16x1xf32, #tpu.memory_space<vmem>>, vector<16x1xf32>
    tpu.vector_store %arg12[%c0_21, %c0_22], %30 {strides = array<i32>} : memref<16x1xf32, #tpu.memory_space<vmem>>, vector<16x1xf32>,
    %c0_23 = arith.constant 0 : index
    %c0_24 = arith.constant 0 : index
    %32 = vector.load %arg11[%c0_23, %c0_24] : memref<16x1xf32, #tpu.memory_space<vmem>>, vector<16x1xf32>
    tpu.vector_store %arg11[%c0_23, %c0_24], %17 {strides = array<i32>} : memref<16x1xf32, #tpu.memory_space<vmem>>, vector<16x1xf32>,
    %c0_i32_25 = arith.constant 0 : i32
    %33 = arith.cmpi eq, %arg1, %c0_i32_25 : i32
    %34 = arith.extui %33 : i1 to i32
    %c0_i32_26 = arith.constant 0 : i32
    %35 = arith.cmpi ne, %34, %c0_i32_26 : i32
    scf.if %35 {
      %36 = arith.extf %3 : vector<16x32xbf16> to vector<16x32xf32>
      %37 = arith.extf %4 : vector<16x32xbf16> to vector<16x32xf32>
      %38 = arith.mulf %36, %37 : vector<16x32xf32>
      %cst_27 = arith.constant dense<0.000000e+00> : vector<16xf32>
      %39 = vector.multi_reduction <add>, %38, %cst_27 [1] : vector<16x32xf32> to vector<16xf32>
      %40 = vector.shape_cast %39 : vector<16xf32> to vector<16x1xf32>
      %c0_i32_28 = arith.constant 0 : i32
      %41 = vector.broadcast %c0_i32_28 : i32 to vector<16x1xi32>
      %42 = arith.cmpi sge, %6, %41 : vector<16x1xi32>
      %43 = arith.extui %42 : vector<16x1xi1> to vector<16x1xi32>
      %44 = arith.sitofp %43 : vector<16x1xi32> to vector<16x1xf32>
      %c0_29 = arith.constant 0 : index
      %c0_30 = arith.constant 0 : index
      %45 = vector.load %arg11[%c0_29, %c0_30] : memref<16x1xf32, #tpu.memory_space<vmem>>, vector<16x1xf32>
      %c0_31 = arith.constant 0 : index
      %c0_32 = arith.constant 0 : index
      %46 = vector.load %arg12[%c0_31, %c0_32] : memref<16x1xf32, #tpu.memory_space<vmem>>, vector<16x1xf32>
      %cst_33 = arith.constant 1.000000e-30 : f32
      %47 = vector.broadcast %cst_33 : f32 to vector<16x1xf32>
      %48 = arith.maximumf %46, %47 : vector<16x1xf32>
      %49 = math.log %48 : vector<16x1xf32>
      %50 = arith.addf %45, %49 : vector<16x1xf32>
      %51 = arith.subf %40, %50 : vector<16x1xf32>
      %52 = arith.mulf %44, %51 : vector<16x1xf32>
      %53 = vector.shape_cast %52 : vector<16x1xf32> to vector<1x16x1xf32>
      %cst_34 = arith.constant dense<0.000000e+00> : vector<1xf32>
      %54 = vector.multi_reduction <add>, %53, %cst_34 [1, 2] : vector<1x16x1xf32> to vector<1xf32>
      %55 = vector.shape_cast %54 : vector<1xf32> to vector<1x1x1xf32>
      %56 = vector.extract %55[0, 0, 0] : f32 from vector<1x1x1xf32>
      %cst_35 = arith.constant 0.000000e+00 : f32
      %57 = arith.subf %cst_35, %56 : f32
      %58 = tpu.iota {dimensions = array<i32: 2>} : vector<1x1x128xi32>
      %c0_i32_36 = arith.constant 0 : i32
      %59 = vector.broadcast %c0_i32_36 : i32 to vector<1x1x128xi32>
      %60 = arith.cmpi eq, %58, %59 : vector<1x1x128xi32>
      %c1_i32 = arith.constant 1 : i32
      %61 = vector.broadcast %c1_i32 : i32 to vector<1x1x128xi32>
      %62 = arith.cmpi eq, %58, %61 : vector<1x1x128xi32>
      %cst_37 = arith.constant 0.000000e+00 : f32
      %63 = vector.broadcast %57 : f32 to vector<1x1x128xf32>
      %64 = vector.broadcast %cst_37 : f32 to vector<1x1x128xf32>
      %65 = arith.select %62, %63, %64 : vector<1x1x128xi1>, vector<1x1x128xf32>
      %cst_38 = arith.constant 0.000000e+00 : f32
      %66 = vector.broadcast %cst_38 : f32 to vector<1x1x128xf32>
      %67 = arith.select %60, %66, %65 : vector<1x1x128xi1>, vector<1x1x128xf32>
      %c0_39 = arith.constant 0 : index
      %c0_40 = arith.constant 0 : index
      %c0_41 = arith.constant 0 : index
      %68 = vector.load %arg8[%c0_39, %c0_40, %c0_41] : memref<1x1x128xf32, #tpu.memory_space<vmem>>, vector<1x1x128xf32>
      tpu.vector_store %arg8[%c0_39, %c0_40, %c0_41], %67 {strides = array<i32>} : memref<1x1x128xf32, #tpu.memory_space<vmem>>, vector<1x1x128xf32>,
    } else {
    }
    return
  }
  func.func @transform_0(%arg0: i32, %arg1: i32) -> (i32, i32) {
    %c0_i32 = arith.constant 0 : i32
    %c0_i32_0 = arith.constant 0 : i32
    return %arg0, %c0_i32 : i32, i32
  }
  func.func @transform_1(%arg0: i32, %arg1: i32) -> (i32, i32) {
    %c0_i32 = arith.constant 0 : i32
    %c0_i32_0 = arith.constant 0 : i32
    return %arg0, %c0_i32 : i32, i32
  }
  func.func @transform_2(%arg0: i32, %arg1: i32) -> (i32, i32) {
    %c0_i32 = arith.constant 0 : i32
    %c0_i32_0 = arith.constant 0 : i32
    return %arg1, %c0_i32 : i32, i32
  }
  func.func @transform_3(%arg0: i32, %arg1: i32) -> (i32, i32) {
    %c0_i32 = arith.constant 0 : i32
    %c0_i32_0 = arith.constant 0 : i32
    return %arg1, %c0_i32 : i32, i32
  }
  func.func @transform_4(%arg0: i32, %arg1: i32) -> (i32, i32) {
    %c0_i32 = arith.constant 0 : i32
    %c0_i32_0 = arith.constant 0 : i32
    return %arg0, %c0_i32 : i32, i32
  }
  func.func @transform_5(%arg0: i32, %arg1: i32) -> (i32, i32) {
    %c0_i32 = arith.constant 0 : i32
    %c0_i32_0 = arith.constant 0 : i32
    return %c0_i32, %arg1 : i32, i32
  }
  func.func @transform_6(%arg0: i32, %arg1: i32) -> (i32, i32, i32) {
    %c0_i32 = arith.constant 0 : i32
    %c0_i32_0 = arith.constant 0 : i32
    %c0_i32_1 = arith.constant 0 : i32
    return %arg0, %c0_i32, %c0_i32_0 : i32, i32, i32
  }
}

</mosaic_0001>

<bundles_post_ra>
// kernel: _forward_impl.10
= control target key start
LH: loop header
LB: loop body
LE: loop exit
PB: predicated region body
PF: predicated region fallthrough
CT: control target
= control target key end

     0   :  { %vm51_vm0 = vcmask 1024   ;;  %vm20_vm2 = vcmask 254976   ;;  %v103_v4 = vmov 0.0   ;;  %vm37_vm3 = vcmask 253952   ;;  %s159_s0 = inlined_call_operand.vmem [shape: f32[2,32], index: 0, kind: input, shape index: {}]   ;;  %s160_s1 = inlined_call_operand.vmem [shape: f32[2,32], index: 1, kind: input, shape index: {}]   ;;  %s161_s2 = inlined_call_operand.vmem [shape: s32[2,1], index: 2, kind: input, shape index: {}]   ;;  %s162_s3 = inlined_call_operand.vmem [shape: bf16[2,32], index: 3, kind: output, shape index: {0}]   ;;  %s163_s4 = inlined_call_operand.vmem [shape: bf16[2,32], index: 4, kind: output, shape index: {1}]   ;;  %s164_s5 = inlined_call_operand.vmem [shape: f32[1,1,128], index: 5, kind: output, shape index: {2}]  }
   0x1   :  { %v17_v0 = vld [vmem:[%s159_s0] sm:$0x3]  ;;  %v72_v42 = vlaneseq }
   0x2   :  { %v18_v1 = vld [vmem:[%s160_s1] sm:$0x3]  ;;  %v19_v9 = vmul.f32 %v17_v0, %v17_v0 }
   0x3   :  { %v41_v2 = vld [vmem:[%s161_s2] sm:$0x3]  ;;  %v45_v3 = vsub.f32 %v17_v0, %v18_v1  ;;  %v28_v13 = vmul.f32 %v18_v1, %v18_v1  ;;  %v73_v43 = vand.u32 127, %v72_v42 }
   0x4   :  { %vm42_vm1 = vcmp.ge.s32.totalorder %v41_v2, 0  ;;  %v21_v10 = vsel %vm20_vm2, %v19_v9, 0.0 }
   0x5   :  { %v93_v5 = vsel %vm42_vm1, 1.0, %v103_v4  ;;  %v46_v6 = vmul.f32 %v45_v3, %v45_v3  ;;  %v29_v15 = vsel %vm20_vm2, %v28_v13, 0.0  ;;  %vm75_vm4 = vcmp.eq.s32.totalorder %v73_v43, 1 }
   0x6   :  { %v62_v7 = vsel %vm51_vm0, %v93_v5, 0.0  ;;  %vm74_vm5 = vcmp.eq.s32.totalorder %v73_v43, 0 }
   0x7   :  { %63 = vadd.xlane.f32.xlu1 %v62_v7  ;;  %v47_v8 = vsel %vm20_vm2, %v46_v6, 0.0 }
   0x8   :  { %48 = vadd.xlane.f32.xlu0 %v47_v8 }
   0xb   :  { %22 = vadd.xlane.f32.xlu1 %v21_v10 }
  0x90   :  { %v64_v16 = vpop.xlane.xlu1 %63 }
  0x91   :  { %v49_v11 = vpop.xlane.xlu0 %48  ;;  %v65_v23 = vrot.slane %v64_v16, 4 }
  0x92   :  { %v50_v12 = vmul.f32 %v93_v5, %v49_v11 }
  0x93   :  { %v66_v24 = vadd.f32 %v65_v23, %v64_v16 }
  0x94   :  { %v52_v14 = vsel %vm51_vm0, %v50_v12, 0.0  ;;  %v23_v17 = vpop.xlane.xlu1 %22 }
  0x95   :  { %53 = vadd.xlane.f32.xlu0 %v52_v14  ;;  %v24_v18 = vadd.f32 1e-12, %v23_v17  ;;  %v67_v25 = vrot.slane %v66_v24, 2 }
  0x97   :  { %99 = vrsqrt.f32 %v24_v18  ;;  %v68_v29 = vadd.f32 %v67_v25, %v66_v24 }
  0x99   :  { %30 = vadd.xlane.f32.xlu0 %v29_v15  ;;  %v69_v34 = vrot.slane %v68_v29, 1 }
  0x9b   :  { %v70_v37 = vadd.f32 %v69_v34, %v68_v29 }
  0xa4   :  { %v100_v19 = vpop.eup %99 }
  0xa5   :  { %v26_v20 = vmul.f32 2.236068, %v100_v19 }
  0xa7   :  { %v27_v21 = vmul.f32 %v26_v20, %v17_v0 }
  0xa9   :  { %v36_v22 = vpack.c.bf16 %v27_v21, %v27_v21 }
  0xab   :  { %38 = vst.msk [vmem:[%s162_s3] sm:$0x1] %vm37_vm3, %v36_v22 }
 0x11e   :  { %v54_v26 = vpop.xlane.xlu0 %53 }
 0x11f   :  { %v55_v27 = vrot.slane %v54_v26, 4 }
 0x121   :  { %v56_v28 = vadd.f32 %v55_v27, %v54_v26 }
 0x122   :  { %v31_v30 = vpop.xlane.xlu0 %30 }
 0x123   :  { %v57_v31 = vrot.slane %v56_v28, 2  ;;  %v32_v32 = vadd.f32 1e-12, %v31_v30 }
 0x125   :  { %v58_v33 = vadd.f32 %v57_v31, %v56_v28  ;;  %101 = vrsqrt.f32 %v32_v32 }
 0x127   :  { %v59_v35 = vrot.slane %v58_v33, 1 }
 0x129   :  { %v60_v36 = vadd.f32 %v59_v35, %v58_v33 }
 0x12b   :  { %94 = vpush %v60_v36 }
 0x12c   :  { %96 = vpush %v70_v37 }
 0x132   :  { %v102_v38 = vpop.eup %101 }
 0x133   :  { %v34_v39 = vmul.f32 2.236068, %v102_v38 }
 0x135   :  { %v35_v40 = vmul.f32 %v34_v39, %v18_v1 }
 0x137   :  { %v39_v41 = vpack.c.bf16 %v35_v40, %v35_v40 }
 0x139   :  { %40 = vst.msk [vmem:[%s163_s4] sm:$0x1] %vm37_vm3, %v39_v41 }
 0x15c   :  { %s95_s24 = spop %94 }
 0x15d   :  { %v78_v44 = vstv %s95_s24  ;;  %s97_s25 = spop %96 }
 0x15e   :  { %v76_v45 = vstv %s97_s25 }
 0x15f   :  { %v77_v46 = vsel %vm75_vm4, %v76_v45, 0.0 }
 0x160   :  { %v79_v47 = vsel %vm74_vm5, %v78_v44, %v77_v46 }
 0x161   :  { %80 = vst [vmem:[%s164_s5] sm:$0x1] %v79_v47 }

// kernel: _forward_impl.8
= control target key start
LH: loop header
LB: loop body
LE: loop exit
PB: predicated region body
PF: predicated region fallthrough
CT: control target
= control target key end

     0   :  { %vm181_vm0 = vcmask 57344   ;;  %vm24_vm1 = vcmask 64512   ;;  %v237_v2 = vmov 0.0   ;;  %vm238_vm2 = vmmov 0   ;;  %s279_s1 = inlined_call_operand.vmem [shape: f32[2,1,8], index: 1, kind: input, shape index: {}]   ;;  %s280_s0 = inlined_call_operand.vmem [shape: f32[2,8,32], index: 0, kind: input, shape index: {}]   ;;  %s281_s2 = inlined_call_operand.vmem [shape: f32[2,32], index: 2, kind: output, shape index: {}]  }
   0x1   :  { %v22_v0 = vld [vmem:[%s279_s1 + $0x1] sm:$0x1]  ;;  %v21_v1 = vld [vmem:[%s279_s1] sm:$0x1]  ;;  %225 = vmatprep.subr.mxu1 %v237_v2  ;;  %v20_v3 = vld [vmem:[%s280_s0 + $0x8] sm:$0xff]  ;;  %227 = vmatprep.mubr.msk.f32.mxu1 %vm238_vm2, %v237_v2  ;;  %vm17_vm3 = vcmask 1024  }
   0x2   :  { %v185_v4 = vsel %vm181_vm0, %v22_v0, 0.0  ;;  %226 = vmatpush3.msra.mxu1 %v20_v3  ;;  %220 = vmatprep.subr.mxu0 %v237_v2  ;;  %v19_v5 = vld [vmem:[%s280_s0] sm:$0xff]  ;;  %v182_v6 = vsel %vm181_vm0, %v21_v1, 0.0  ;;  %18 = vst.msk [vmem:[#allocation3] sm:$0x3] %vm17_vm3, %v237_v2  ;;  %v239_v7 = vmov 0  }
   0x3   :  { %186 = vadd.xlane.f32.xlu0 %v185_v4  ;;  %228 = vmatmul.mubr.msk.f32.vlgmr.msra.gmra.mxu1 %vm24_vm1, %v22_v0  ;;  %vm174_vm4 = vcmask 1041409   ;;  %vm15_vm5 = vcmask 254976  }
   0x4   :  { %221 = vmatpush3.msra.mxu0 %v19_v5  ;;  %222 = vmatprep.mubr.msk.f32.mxu0 %vm238_vm2, %v237_v2  ;;  %16 = vst.msk [vmem:[#allocation2] sm:$0x3] %vm15_vm5, %v237_v2 }
   0x5   :  { %223 = vmatmul.mubr.msk.f32.vlgmr.msra.gmra.mxu0 %vm24_vm1, %v21_v1  ;;  %233 = vset.pattern.permute.xlu1 %v239_v7 }
   0x6   :  { %234 = vset.pattern.permute.xlu0 %v239_v7 }
   0x7   :  { %183 = vadd.xlane.f32.xlu0 %v182_v6 }
   0x9   :  { %v180_v10 = vld [vmem:[#allocation3] sm:$0x3] }
   0xb   :  { %v23_v18 = vld [vmem:[#allocation2] sm:$0x3] }
  0x8c   :  { %v187_v8 = vpop.xlane.xlu0 %186 }
  0x8d   :  { %v190_v9 = vrot.slane %v187_v8, 7 }
  0x90   :  { %v184_v11 = vpop.xlane.xlu0 %183 }
  0x91   :  { %v191_v12 = vsel %vm174_vm4, %v190_v9, %v184_v11 }
  0x92   :  { %v193_v13 = vadd.f32 %v191_v12, %v180_v10 }
  0x94   :  { %195 = vst.msk [vmem:[#allocation3] sm:$0x3] %vm17_vm3, %v193_v13 }
  0x9b   :  { %v200_v14 = vld [vmem:[#allocation3] sm:$0x3] }
  0x9c   :  { %v201_v15 = vmax.f32 %v200_v14, 1.0 }
  0x9e   :  { %204 = vperm.xlu1 %233, %v201_v15  }
  0xc3   :  { %v167_v16 = vpop.f32.mrf.mxu1 }
  0xc4   :  { %v173_v17 = vrot.slane %v167_v16, 7 }
  0xc5   :  { %v94_v19 = vpop.f32.mrf.mxu0  ;;  %v229_v20 = vpop.f32.mrf.mxu1 }
  0xc6   :  { %v175_v21 = vsel %vm174_vm4, %v173_v17, %v94_v19 }
  0xc7   :  { %v177_v22 = vadd.f32 %v175_v21, %v23_v18  ;;  %v224_v23 = vpop.f32.mrf.mxu0 }
  0xc9   :  { %179 = vst.msk [vmem:[#allocation2] sm:$0x3] %vm15_vm5, %v177_v22 }
  0xd0   :  { %v199_v25 = vld [vmem:[#allocation2] sm:$0x3] }
 0x119   :  { %v205_v24 = vpop.permute.xlu1 %204 }
 0x11a   :  { %235 = vrcp.f32 %v205_v24 }
 0x127   :  { %v236_v26 = vpop.eup %235 }
 0x128   :  { %v208_v27 = vmul.f32 %v236_v26, %v199_v25 }
 0x12a   :  { %209 = vst.msk [vmem:[%s281_s2] sm:$0x3] %vm15_vm5, %v208_v27 }

// kernel: _forward_impl.11
= control target key start
LH: loop header
LB: loop body
LE: loop exit
PB: predicated region body
PF: predicated region fallthrough
CT: control target
= control target key end

     0   :  { %vm47_vm0 = vcmask 261120   ;;  %v300_v0 = vmov 0.0   ;;  %vm301_vm1 = vmmov 0   ;;  %v302_v6 = vmov 0   ;;  %s393_s3 = inlined_call_operand.vmem [shape: bf16[2,32], index: 3, kind: input, shape index: {}, may-alias: {1,3}]   ;;  %s394_s2 = inlined_call_operand.vmem [shape: bf16[2,32], index: 2, kind: input, shape index: {}, may-alias: {0,2}]   ;;  %s395_s4 = inlined_call_operand.vmem [shape: s32[2,1], index: 4, kind: input, shape index: {}]   ;;  %s396_s0 = inlined_call_operand.vmem [shape: bf16[2,32], index: 0, kind: input, shape index: {}, may-alias: {0,2}]   ;;  %s397_s1 = inlined_call_operand.vmem [shape: bf16[2,32], index: 1, kind: input, shape index: {}, may-alias: {1,3}]   ;;  %s398_s5 = inlined_call_operand.vmem [shape: s32[1,2], index: 5, kind: input, shape index: {}]   ;;  %s399_s6 = inlined_call_operand.vmem [shape: f32[1,1,128], index: 6, kind: output, shape index: {}]  }
   0x1   :  { %266 = vmatprep.subr.bf16.mxu0 %v300_v0  ;;  %272 = vmatprep.subr.bf16.mxu1 %v300_v0  ;;  %v36_v1 = vld [vmem:[%s393_s3] sm:$0x1]  ;;  %vm28_vm2 = vcmask 1024   ;;  %v303_v9 = vmov -1e+30   ;;  %vm96_vm4 = vcmask 9216  }
   0x2   :  { %v35_v2 = vld [vmem:[%s394_s2] sm:$0x1]  ;;  %v52_v3 = vsel %vm47_vm0, %v36_v1, 0  ;;  %268 = vmatprep.mubr.msk.bf16.mxu0 %vm301_vm1, %v300_v0  ;;  %274 = vmatprep.mubr.msk.bf16.mxu1 %vm301_vm1, %v300_v0  ;;  %31 = vst.msk [vmem:[#allocation4] sm:$0x3] %vm28_vm2, %v303_v9  ;;  %vm200_vm5 = vcmask 254976  }
   0x3   :  { %v126_v4 = vsel %vm47_vm0, %v35_v2, 0  ;;  %v354_v5 = vld [vmem:[%s395_s4] sm:$0x3]  ;;  %267 = vmatpush3.bf16.xpose.msra.mxu0 %v52_v3  ;;  %286 = vset.pattern.permute.xlu0 %v302_v6  ;;  %29 = vst.msk [vmem:[#allocation2] sm:$0x3] %vm28_vm2, %v303_v9 }
   0x4   :  { %273 = vmatpush3.bf16.xpose.msra.mxu1 %v126_v4  ;;  %287 = vset.pattern.permute.xlu1 %v302_v6  ;;  %v33_v7 = vld [vmem:[%s396_s0] sm:$0x1]  ;;  %30 = vst.msk [vmem:[#allocation3] sm:$0x3] %vm28_vm2, %v300_v0  ;;  %32 = vst.msk [vmem:[#allocation5] sm:$0x3] %vm28_vm2, %v300_v0 }
   0x5   :  { %40 = vperm.xlu0 %286, %v354_v5   ;;  %v34_v8 = vld [vmem:[%s397_s1] sm:$0x1]  ;;  %v197_v39 = vunpack.c.l.bf16 %v33_v7  ;;  %vm204_vm6 = vcmp.ge.s32.totalorder %v354_v5, 0 }
   0x6   :  { %v258_v10 = vld [vmem:[%s398_s5] ss:$0 sm:$0xff]  ;;  %v198_v40 = vunpack.c.l.bf16 %v34_v8 }
   0x8   :  { %v199_v44 = vmul.f32 %v198_v40, %v197_v39 }
   0x9   :  { %v169_v24 = vld [vmem:[#allocation4] sm:$0x3] }
   0xa   :  { %269 = vmatmul.mubr.msk.bf16.vlgmr.msra.gmra.mxu0 %vm47_vm0, %v33_v7  ;;  %v95_v25 = vld [vmem:[#allocation2] sm:$0x3]  ;;  %v201_v47 = vsel %vm200_vm5, %v199_v44, 0.0 }
   0xb   :  { %275 = vmatmul.mubr.msk.bf16.vlgmr.msra.gmra.mxu1 %vm47_vm0, %v34_v8  ;;  %v110_v51 = vld [vmem:[#allocation3] sm:$0x3]  ;;  %v183_v55 = vld [vmem:[#allocation5] sm:$0x3]  ;;  %v261_v8 = vsel %vm204_vm6, 1.0, %v300_v0 }
  0x80   :  { %v41_v11 = vpop.permute.xlu0 %40 }
  0x81   :  { %vm46_vm3 = vcmp.eq.s32.totalorder %v41_v11, %v258_v10 }
  0xca   :  { %v88_v12 = vpop.f32.mrf.mxu0 }
  0xcb   :  { %v162_v13 = vpop.f32.mrf.mxu1  ;;  %v94_v14 = vsel %vm46_vm3, %v88_v12, -1e+30 }
  0xcc   :  { %v168_v15 = vsel %vm46_vm3, %v162_v13, -1e+30  ;;  %v270_v16 = vpop.f32.mrf.mxu0  ;;  %v97_v19 = vsel %vm96_vm4, %v94_v14, -inf }
  0xcd   :  { %v276_v17 = vpop.f32.mrf.mxu1  ;;  %v170_v18 = vsel %vm96_vm4, %v168_v15, -inf  ;;  %98 = vmax.xlane.f32.xlu0 %v97_v19 }
  0xce   :  { %171 = vmax.xlane.f32.xlu1 %v170_v18  ;;  %v91_v20 = vpop.f32.mrf.mxu0 }
  0xcf   :  { %v165_v21 = vpop.f32.mrf.mxu1 }
  0xd0   :  { %v271_v22 = vpop.f32.mrf.mxu0 }
  0xd1   :  { %v277_v23 = vpop.f32.mrf.mxu1 }
 0x156   :  { %v99_v27 = vpop.xlane.xlu0 %98 }
 0x157   :  { %v172_v26 = vpop.xlane.xlu1 %171  ;;  %v100_v29 = vmax.f32 %v95_v25, %v99_v27 }
 0x158   :  { %v173_v28 = vmax.f32 %v169_v24, %v172_v26 }
 0x159   :  { %v111_v31 = vsub.f32 %v95_v25, %v100_v29  ;;  %121 = vst.msk [vmem:[#allocation2] sm:$0x3] %vm28_vm2, %v100_v29  ;;  %103 = vperm.xlu1 %287, %v100_v29  }
 0x15a   :  { %v184_v30 = vsub.f32 %v169_v24, %v173_v28  ;;  %193 = vst.msk [vmem:[#allocation4] sm:$0x3] %vm28_vm2, %v173_v28 }
 0x15b   :  { %v112_v48 = vmul.f32 1.442695, %v111_v31 }
 0x15c   :  { %v185_v49 = vmul.f32 1.442695, %v184_v30  ;;  %v245_v30 = vlaneseq }
 0x15d   :  { %176 = vperm.xlu1 %287, %v173_v28  }
 0x15e   :  { %v246_v31 = vand.u32 127, %v245_v30 }
 0x160   :  { %v207_v4 = vld [vmem:[#allocation2] sm:$0x3]  ;;  %vm248_vm7 = vcmp.eq.s32.totalorder %v246_v31, 1  ;;  %vm247_vm8 = vcmp.eq.s32.totalorder %v246_v31, 0 }
 0x161   :  { %v226_v11 = vld [vmem:[#allocation4] sm:$0x3] }
 0x1d4   :  { %v104_v32 = vpop.permute.xlu1 %103 }
 0x1d5   :  { %v106_v33 = vsub.f32 %v94_v14, %v104_v32 }
 0x1d7   :  { %v107_v34 = vmul.f32 1.442695, %v106_v33 }
 0x1d8   :  { %v177_v35 = vpop.permute.xlu1 %176 }
 0x1d9   :  { %288 = vpow2.f32 %v107_v34  ;;  %v179_v36 = vsub.f32 %v168_v15, %v177_v35 }
 0x1db   :  { %v180_v37 = vmul.f32 1.442695, %v179_v36 }
 0x1dd   :  { %290 = vpow2.f32 %v180_v37 }
 0x1de   :  { %292 = vpow2.f32 %v112_v48 }
 0x1df   :  { %294 = vpow2.f32 %v185_v49 }
 0x1e6   :  { %v289_v38 = vpop.eup %288 }
 0x1e7   :  { %v109_v41 = vsel %vm46_vm3, %v289_v38, 0.0 }
 0x1e8   :  { %v115_v42 = vsel %vm96_vm4, %v109_v41, 0.0 }
 0x1e9   :  { %116 = vadd.xlane.f32.xlu1 %v115_v42 }
 0x1ea   :  { %v291_v43 = vpop.eup %290 }
 0x1eb   :  { %v182_v45 = vsel %vm46_vm3, %v291_v43, 0.0  ;;  %v293_v50 = vpop.eup %292 }
 0x1ec   :  { %v188_v46 = vsel %vm96_vm4, %v182_v45, 0.0  ;;  %v114_v52 = vmul.f32 %v293_v50, %v110_v51  ;;  %v295_v53 = vpop.eup %294 }
 0x1ed   :  { %189 = vadd.xlane.f32.xlu0 %v188_v46  ;;  %v187_v57 = vmul.f32 %v295_v53, %v183_v55 }
 0x1f1   :  { %202 = vadd.xlane.f32.xlu0 %v201_v47 }
 0x272   :  { %v117_v54 = vpop.xlane.xlu1 %116 }
 0x273   :  { %v118_v56 = vadd.f32 %v117_v54, %v114_v52 }
 0x275   :  { %120 = vst.msk [vmem:[#allocation3] sm:$0x3] %vm28_vm2, %v118_v56 }
 0x276   :  { %v190_v58 = vpop.xlane.xlu0 %189 }
 0x277   :  { %v191_v59 = vadd.f32 %v190_v58, %v187_v57 }
 0x279   :  { %192 = vst.msk [vmem:[#allocation5] sm:$0x3] %vm28_vm2, %v191_v59 }
 0x27a   :  { %v203_v3 = vpop.xlane.xlu0 %202 }
 0x27c   :  { %v208_v60 = vld [vmem:[#allocation3] sm:$0x3] }
 0x27d   :  { %v209_v61 = vmax.f32 %v208_v60, 1e-30 }
 0x27f   :  { %296 = vlog2.f32 %v209_v61 }
 0x280   :  { %v227_v62 = vld [vmem:[#allocation5] sm:$0x3] }
 0x281   :  { %v228_v63 = vmax.f32 %v227_v62, 1e-30 }
 0x283   :  { %298 = vlog2.f32 %v228_v63 }
 0x28c   :  { %v297_v1 = vpop.eup %296 }
 0x28d   :  { %v211_v2 = vmul.f32 0.6931472, %v297_v1 }
 0x28f   :  { %v212_v6 = vadd.f32 %v211_v2, %v207_v4 }
 0x290   :  { %v299_v7 = vpop.eup %298 }
 0x291   :  { %v230_v9 = vmul.f32 0.6931472, %v299_v7  ;;  %v213_v10 = vsub.f32 %v203_v3, %v212_v6 }
 0x293   :  { %v231_v12 = vadd.f32 %v230_v9, %v226_v11  ;;  %v214_v13 = vmul.f32 %v261_v8, %v213_v10 }
 0x295   :  { %v232_v14 = vsub.f32 %v203_v3, %v231_v12  ;;  %v215_v15 = vsel %vm28_vm2, %v214_v13, 0.0 }
 0x296   :  { %216 = vadd.xlane.f32.xlu0 %v215_v15 }
 0x297   :  { %v233_v16 = vmul.f32 %v261_v8, %v232_v14 }
 0x299   :  { %v234_v17 = vsel %vm28_vm2, %v233_v16, 0.0 }
 0x29a   :  { %235 = vadd.xlane.f32.xlu0 %v234_v17 }
 0x31f   :  { %v217_v5 = vpop.xlane.xlu0 %216 }
 0x320   :  { %v218_v18 = vrot.slane %v217_v5, 4 }
 0x322   :  { %v219_v19 = vadd.f32 %v218_v18, %v217_v5 }
 0x323   :  { %v236_v20 = vpop.xlane.xlu0 %235 }
 0x324   :  { %v220_v21 = vrot.slane %v219_v19, 2  ;;  %v237_v22 = vrot.slane %v236_v20, 4 }
 0x326   :  { %v238_v0 = vadd.f32 %v237_v22, %v236_v20  ;;  %v221_v23 = vadd.f32 %v220_v21, %v219_v19 }
 0x328   :  { %v239_v24 = vrot.slane %v238_v0, 2  ;;  %v222_v25 = vrot.slane %v221_v23, 1 }
 0x32a   :  { %v240_v26 = vadd.f32 %v239_v24, %v238_v0  ;;  %v223_v27 = vadd.f32 %v222_v25, %v221_v23 }
 0x32c   :  { %278 = vpush %v223_v27  ;;  %v241_v28 = vrot.slane %v240_v26, 1 }
 0x32e   :  { %v242_v29 = vadd.f32 %v241_v28, %v240_v26 }
 0x330   :  { %280 = vpush %v242_v29 }
 0x35d   :  { %s279_s1 = spop %278 }
 0x35e   :  { %s225_s5 = ssub.f32 0.0, %s279_s1 }
 0x360   :  { %v251_v33 = vstv %s225_s5 }
 0x361   :  { %s281_s29 = spop %280 }
 0x362   :  { %s244_s30 = ssub.f32 0.0, %s281_s29 }
 0x364   :  { %v249_v32 = vstv %s244_s30 }
 0x365   :  { %v250_v34 = vsel %vm248_vm7, %v249_v32, 0.0 }
 0x366   :  { %v252_v35 = vsel %vm247_vm8, %v251_v33, %v250_v34 }
 0x367   :  { %253 = vst [vmem:[%s399_s6] sm:$0x1] %v252_v35 }

// kernel: _forward_impl.9
= control target key start
LH: loop header
LB: loop body
LE: loop exit
PB: predicated region body
PF: predicated region fallthrough
CT: control target
= control target key end

     0   :  { %7 = vsyncpa [#allocation5], 0  ;;  %s285_s9 = smov [#allocation4]   ;;  %s323_s0 = inlined_call_operand.hbm [shape: f32[2,16,32], index: 0, kind: input, shape index: {}]   ;;  %s324_s1 = inlined_call_operand.vmem [shape: f32[2,1,16], index: 1, kind: input, shape index: {}]   ;;  %s325_s2 = inlined_call_operand.vmem [shape: f32[2,32], index: 2, kind: output, shape index: {}]  }
   0x1   :  { %s13_s10 = sshll.u32 %s285_s9, 4  ;;  %s14_s10 = int_to_ptr.vmem [resolvable:$true] %s13_s10 }
   0x2   :  { %s271_s11 = scalar_lea.vmem %s14_s10, 512  ;;  %p276_p1 = scmp.lt.s32.totalorder %s14_s10, %s14_s10 }
   0x3   :  { %p272_p0 = scmp.ne.s32.totalorder %s14_s10, %s271_s11  ;;  %p277_p2 = scmp.lt.s32.totalorder %s271_s11, %s271_s11 }
   0x5   :  { %p278_p3 = por %p277_p2, %p276_p1 }
   0x7   :  { %p279_p4 = pnand %p278_p3, %p272_p0 }
   0x9   :  { %282 = shalt.err (!%p279_p4)
}
   0xa   :  { %s286_s12 = smov 128   ;;  %s287_s13 = smov 8  }
   0xb   :  { %19 = dma.hbm_to_vmem [thread:$0]  %s323_s0, 512, %s14_s10, [#allocation5], %s286_s12, %s286_s12, %s287_s13  }
   0xc   :  { %283 = dma.done.wait [#allocation5], 512  }
   0xd   :  { %284 = vsyncadd [#allocation5], 4294966784  ;;  %v288_v0 = vmov 0.0   ;;  %vm289_vm0 = vmmov 0   ;;  %vm197_vm1 = vcmask 122880   ;;  %v36_v3 = vld [vmem:[#allocation4 + $0x18] sm:$0xff] }
   0xe   :  { %246 = vmatprep.subr.mxu1 %v288_v0  ;;  %239 = vmatprep.subr.mxu0 %v288_v0  ;;  %v38_v1 = vld [vmem:[%s324_s1 + $0x1] sm:$0x1]  ;;  %v37_v2 = vld [vmem:[%s324_s1] sm:$0x1]  ;;  %v34_v5 = vld [vmem:[#allocation4 + $0x8] sm:$0xff]  ;;  %vm40_vm2 = vcmask 130048  }
   0xf   :  { %250 = vmatprep.mubr.msk.f32.mxu1 %vm289_vm0, %v288_v0  ;;  %243 = vmatprep.mubr.msk.f32.mxu0 %vm289_vm0, %v288_v0  ;;  %v201_v4 = vsel %vm197_vm1, %v38_v1, 0.0  ;;  %v35_v6 = vld [vmem:[#allocation4 + $0x10] sm:$0xff]  ;;  %v33_v7 = vld [vmem:[#allocation4] sm:$0xff]  ;;  %v198_v8 = vsel %vm197_vm1, %v37_v2, 0.0  ;;  %vm31_vm3 = vcmask 1024   ;;  %v290_v9 = vmov 0  }
  0x10   :  { %247 = vmatpush3.msra.mxu1 %v36_v3  ;;  %202 = vadd.xlane.f32.xlu0 %v201_v4  ;;  %32 = vst.msk [vmem:[#allocation3] sm:$0x3] %vm31_vm3, %v288_v0  ;;  %vm190_vm4 = vcmask 1041409   ;;  %vm29_vm5 = vcmask 254976  }
  0x11   :  { %248 = vmatprep.subr.mxu1 %v288_v0  ;;  %240 = vmatpush3.msra.mxu0 %v34_v5  ;;  %30 = vst.msk [vmem:[#allocation2] sm:$0x3] %vm29_vm5, %v288_v0 }
  0x12   :  { %249 = vmatpush3.msra.mxu1 %v35_v6  ;;  %241 = vmatprep.subr.mxu0 %v288_v0 }
  0x13   :  { %251 = vmatmul.mubr.msk.f32.vlgmr.msra.gmra.mxu1 %vm40_vm2, %v38_v1  ;;  %242 = vmatpush3.msra.mxu0 %v33_v7 }
  0x14   :  { %199 = vadd.xlane.f32.xlu0 %v198_v8  ;;  %244 = vmatmul.mubr.msk.f32.vlgmr.msra.gmra.mxu0 %vm40_vm2, %v37_v2 }
  0x15   :  { %259 = vset.pattern.permute.xlu1 %v290_v9  ;;  %260 = vset.pattern.permute.xlu0 %v290_v9 }
  0x17   :  { %v196_v12 = vld [vmem:[#allocation3] sm:$0x3] }
  0x18   :  { %v39_v20 = vld [vmem:[#allocation2] sm:$0x3] }
  0x99   :  { %v203_v10 = vpop.xlane.xlu0 %202 }
  0x9a   :  { %v206_v11 = vrot.slane %v203_v10, 7 }
  0x9d   :  { %v200_v13 = vpop.xlane.xlu0 %199 }
  0x9e   :  { %v207_v14 = vsel %vm190_vm4, %v206_v11, %v200_v13 }
  0x9f   :  { %v209_v15 = vadd.f32 %v207_v14, %v196_v12 }
  0xa1   :  { %211 = vst.msk [vmem:[#allocation3] sm:$0x3] %vm31_vm3, %v209_v15 }
  0xa8   :  { %v216_v16 = vld [vmem:[#allocation3] sm:$0x3] }
  0xa9   :  { %v217_v17 = vmax.f32 %v216_v16, 1.0 }
  0xab   :  { %220 = vperm.xlu1 %259, %v217_v17  }
  0xd3   :  { %v183_v18 = vpop.f32.mrf.mxu1 }
  0xd4   :  { %v189_v19 = vrot.slane %v183_v18, 7  ;;  %v110_v21 = vpop.f32.mrf.mxu0 }
  0xd5   :  { %v252_v22 = vpop.f32.mrf.mxu1 }
  0xd6   :  { %v191_v23 = vsel %vm190_vm4, %v189_v19, %v110_v21  ;;  %v245_v25 = vpop.f32.mrf.mxu0 }
  0xd7   :  { %v193_v24 = vadd.f32 %v191_v23, %v39_v20 }
  0xd9   :  { %195 = vst.msk [vmem:[#allocation2] sm:$0x3] %vm29_vm5, %v193_v24 }
  0xe0   :  { %v215_v27 = vld [vmem:[#allocation2] sm:$0x3] }
 0x126   :  { %v221_v26 = vpop.permute.xlu1 %220 }
 0x127   :  { %261 = vrcp.f32 %v221_v26 }
 0x134   :  { %v262_v28 = vpop.eup %261 }
 0x135   :  { %v224_v29 = vmul.f32 %v262_v28, %v215_v27 }
 0x137   :  { %225 = vst.msk [vmem:[%s325_s2] sm:$0x3] %vm29_vm5, %v224_v29 }
 0x138   :  { %230 = vsyncpa [#allocation5], 1 }

// kernel: _forward_impl.7
= control target key start
LH: loop header
LB: loop body
LE: loop exit
PB: predicated region body
PF: predicated region fallthrough
CT: control target
= control target key end

     0   :  { %s498_s12 = smov 0   ;;  %s545_s0 = inlined_call_operand.vmem [shape: f32[2,8,32], index: 0, kind: input, shape index: {}]   ;;  %s546_s1 = inlined_call_operand.vmem [shape: f32[2,16,32], index: 1, kind: input, shape index: {}]   ;;  %s547_s2 = inlined_call_operand.vmem [shape: f32[32,32], index: 2, kind: input, shape index: {}]   ;;  %s548_s3 = inlined_call_operand.vmem [shape: f32[2,8,32], index: 3, kind: output, shape index: {}]  }
   0x1 LB: > { %s412_s13 = sadd.s32 4294967295, %s474_s12   ;;  %p416_p0 = scmp.ge.s32.totalorder %s474_s12, 1  ;;  %s474_s12 = sphi %s498_s12, %s13_s12  }
   0x2   : > { %p146_p1 = scmp.lt.s32.totalorder %s474_s12, 3 }
   0x4   : > { %p147_p2 = pnand %p416_p0, %p146_p1 }
   0x5   : > { %p173_p3 = scmp.lt.s32.totalorder (!%p147_p2), %s412_s13, 1 }
   0x6   : > { %150 = sbr.rel (%p147_p2) target bundleno = 773 (0x305), region = 32 }
   0xb   : > { %v476_v0 = vmov 0.0   ;;  %vm477_vm0 = vmmov 0   ;;  %s550_s13 = smov (!%p173_p3, %s412_s13), 1  ;;  %vm193_vm1 = vcmask 261120   ;;  %vm240_vm2 = vcmask 130048   ;;  %v298_v19 = vld [vmem:[%s547_s2 + $0x10] sm:$0xff] }
   0xc   : > { %434 = vmatprep.subr.bf16.mxu0 %v476_v0  ;;  %436 = vmatprep.mubr.msk.bf16.mxu0 %vm477_vm0, %v476_v0  ;;  %s417_s14 = sshll.u32 %s550_s13, 3  ;;  %s426_s15 = sshll.u32 %s550_s13, 4  ;;  %v299_v20 = vld [vmem:[%s547_s2 + $0x18] sm:$0xff]  ;;  %v296_v22 = vld [vmem:[%s547_s2] sm:$0xff]  ;;  %v297_v23 = vld [vmem:[%s547_s2 + $0x8] sm:$0xff] }
   0xd   : > { %440 = vmatprep.subr.bf16.mxu1 %v476_v0  ;;  %442 = vmatprep.mubr.msk.bf16.mxu1 %vm477_vm0, %v476_v0  ;;  %s181_s18 = scalar_lea.vmem %s546_s1, %s426_s15  ;;  %s176_s21 = scalar_lea.vmem %s545_s0, %s417_s14  ;;  %v301_v21 = vpack.c.bf16 %v299_v20, %v298_v19  ;;  %v300_v24 = vpack.c.bf16 %v297_v23, %v296_v22 }
   0xe   : > { %v190_v1 = vld [vmem:[%s181_s18] sm:$0xff]  ;;  %v191_v2 = vld [vmem:[%s181_s18 + $0x8] sm:$0xff]  ;;  %s185_s5 = scalar_lea.vmem %s548_s3, %s417_s14 }
   0xf   : > { %v187_v3 = vld [vmem:[%s176_s21] sm:$0xff]  ;;  %v192_v4 = vpack.c.bf16 %v191_v2, %v190_v1 }
  0x10   : > { %v188_v6 = vmul.f32 0.17677669, %v187_v3 }
  0x11   : > { %v198_v5 = vsel %vm193_vm1, %v192_v4, 0  ;;  %441 = vmatpush3.bf16.msra.mxu1 %v192_v4 }
  0x12   : > { %435 = vmatpush3.bf16.xpose.msra.mxu0 %v198_v5  ;;  %446 = vmatprep.subr.bf16.mxu1 %v476_v0  ;;  %v189_v7 = vpack.c.bf16 %v188_v6, %v188_v6 }
  0x19   : > { %437 = vmatmul.mubr.msk.bf16.vlgmr.msra.gmra.mxu0 %vm193_vm1, %v189_v7 }
  0xd9   : > { %v234_v8 = vpop.f32.mrf.mxu0 }
  0xda   : > { %v241_v9 = vsel %vm240_vm2, %v234_v8, -inf }
  0xdb   : > { %242 = vmax.xlane.f32.xlu0 %v241_v9  ;;  %v438_v10 = vpop.f32.mrf.mxu0 }
  0xdd   : > { %v237_v11 = vpop.f32.mrf.mxu0 }
  0xdf   : > { %v439_v12 = vpop.f32.mrf.mxu0 }
 0x164   : > { %v243_v13 = vpop.xlane.xlu0 %242 }
 0x165   : > { %v244_v14 = vsub.f32 %v234_v8, %v243_v13 }
 0x167   : > { %v245_v15 = vmul.f32 1.442695, %v244_v14 }
 0x169   : > { %464 = vpow2.f32 %v245_v15 }
 0x176   : > { %v465_v16 = vpop.eup %464 }
 0x177   : > { %v247_v17 = vsel %vm240_vm2, %v465_v16, 0.0  ;;  %v250_v18 = vpack.c.bf16 %v465_v16, %v465_v16 }
 0x178   : > { %248 = vadd.xlane.f32.xlu0 %v247_v17 }
 0x179   : > { %443 = vmatmul.mubr.msk.bf16.vlgmr.msra.gmra.mxu1 %vm240_vm2, %v250_v18 }
 0x17a   : > { %450 = vmatprep.mubr.msk.bf16.mxu1 %vm477_vm0, %v476_v0  ;;  %447 = vmatpush3.bf16.msra.mxu1 %v301_v21 }
 0x17b   : > { %448 = vmatprep.subr.bf16.mxu1 %v476_v0 }
 0x17e   : > { %449 = vmatpush3.bf16.msra.mxu1 %v300_v24 }
 0x201   : > { %v249_v25 = vpop.xlane.xlu0 %248 }
 0x202   : > { %466 = vrcp.f32 %v249_v25 }
 0x20f   : > { %v467_v26 = vpop.eup %466 }
 0x239   : > { %v288_v27 = vpop.f32.mrf.mxu1 }
 0x23a   : > { %v295_v28 = vmul.f32 %v467_v26, %v288_v27 }
 0x23b   : > { %v444_v29 = vpop.f32.mrf.mxu1 }
 0x23c   : > { %v302_v30 = vpack.c.bf16 %v295_v28, %v295_v28 }
 0x23d   : > { %v291_v31 = vpop.f32.mrf.mxu1 }
 0x23e   : > { %451 = vmatmul.mubr.msk.bf16.vlgmr.msra.gmra.mxu1 %vm193_vm1, %v302_v30 }
 0x23f   : > { %v445_v32 = vpop.f32.mrf.mxu1 }
 0x2fe   : > { %v340_v33 = vpop.f32.mrf.mxu1 }
 0x2ff   : > { %346 = vst.msk [vmem:[%s185_s5] sm:$0xff] %vm193_vm1, %v340_v33 }
 0x300   : > { %v452_v34 = vpop.f32.mrf.mxu1 }
 0x302   : > { %v343_v35 = vpop.f32.mrf.mxu1 }
 0x304   : > { %v453_v36 = vpop.f32.mrf.mxu1 }
 0x305 PF: > { %s13_s12 = sadd.s32 1, %s474_s12  }
 0x306   : > { %p10_p4 = scmp.ge.s32.totalorder %s13_s12, 4  }
 0x308   :  { %12 = sbr.rel (!%p10_p4) target bundleno = 1 (0x1), region = 65 }

// kernel: _forward_impl.12
= control target key start
LH: loop header
LB: loop body
LE: loop exit
PB: predicated region body
PF: predicated region fallthrough
CT: control target
= control target key end

     0   :  { %vm23_vm0 = vcmask 261120   ;;  %v164_v16 = vmov 0.0   ;;  %vm95_vm3 = vcmask 7168   ;;  %vm62_vm4 = vcmask 257024   ;;  %s250_s0 = inlined_call_operand.vmem [shape: f32[16,32], index: 0, kind: input, shape index: {}]   ;;  %s251_s1 = inlined_call_operand.vmem [shape: f32[16,32], index: 1, kind: input, shape index: {}]   ;;  %s252_s2 = inlined_call_operand.vmem [shape: s32[16,1], index: 2, kind: input, shape index: {}]   ;;  %s253_s3 = inlined_call_operand.vmem [shape: bf16[16,32], index: 3, kind: output, shape index: {0}]   ;;  %s254_s4 = inlined_call_operand.vmem [shape: bf16[16,32], index: 4, kind: output, shape index: {1}]   ;;  %s255_s5 = inlined_call_operand.vmem [shape: f32[1,1,128], index: 5, kind: output, shape index: {2}]  }
   0x1   :  { %v17_v0 = vld [vmem:[%s250_s0] sm:$0xff]  ;;  %v204_v2 = vld [vmem:[%s250_s0 + $0x8] sm:$0xff] }
   0x2   :  { %v19_v1 = vld [vmem:[%s251_s1] sm:$0xff]  ;;  %v209_v4 = vld [vmem:[%s251_s1 + $0x8] sm:$0xff]  ;;  %v21_v10 = vmul.f32 %v17_v0, %v17_v0  ;;  %v22_v29 = vmul.f32 %v204_v2, %v204_v2 }
   0x3   :  { %v83_v3 = vsub.f32 %v17_v0, %v19_v1  ;;  %v84_v5 = vsub.f32 %v204_v2, %v209_v4  ;;  %v38_v12 = vmul.f32 %v19_v1, %v19_v1  ;;  %v75_v14 = vld [vmem:[%s252_s2] sm:$0xff]  ;;  %v76_v15 = vld [vmem:[%s252_s2 + $0x8] sm:$0xff]  ;;  %v39_v31 = vmul.f32 %v209_v4, %v209_v4 }
   0x4   :  { %v24_v11 = vsel %vm23_vm0, %v21_v10, 0.0  ;;  %vm77_vm1 = vcmp.ge.s32.totalorder %v75_v14, 0  ;;  %vm78_vm2 = vcmp.ge.s32.totalorder %v76_v15, 0  ;;  %v27_v30 = vsel %vm23_vm0, %v22_v29, 0.0 }
   0x5   :  { %v85_v6 = vmul.f32 %v83_v3, %v83_v3  ;;  %v86_v7 = vmul.f32 %v84_v5, %v84_v5  ;;  %v40_v13 = vsel %vm23_vm0, %v38_v12, 0.0  ;;  %v145_v17 = vsel %vm77_vm1, 1.0, %v164_v16 }
   0x6   :  { %v146_v19 = vsel %vm78_vm2, 1.0, %v164_v16  ;;  %v108_v25 = vsel %vm95_vm3, %v145_v17, 0.0  ;;  %v43_v32 = vsel %vm23_vm0, %v39_v31, 0.0 }
   0x7   :  { %v87_v8 = vsel %vm23_vm0, %v85_v6, 0.0  ;;  %v90_v9 = vsel %vm23_vm0, %v86_v7, 0.0  ;;  %v109_v26 = vsel %vm95_vm3, %v146_v19, 0.0 }
   0x8   :  { %88 = vadd.xlane.f32.xlu0 %v87_v8  ;;  %v110_v28 = vadd.f32 %v109_v26, %v108_v25 }
   0xc   :  { %91 = vadd.xlane.f32.xlu0 %v90_v9  ;;  %v120_v9 = vlaneseq }
   0xe   :  { %v121_v10 = vand.u32 127, %v120_v9 }
  0x10   :  { %25 = vadd.xlane.f32.xlu0 %v24_v11  ;;  %vm123_vm5 = vcmp.eq.s32.totalorder %v121_v10, 1  ;;  %vm122_vm6 = vcmp.eq.s32.totalorder %v121_v10, 0 }
  0x14   :  { %41 = vadd.xlane.f32.xlu0 %v40_v13 }
  0x91   :  { %v89_v18 = vpop.xlane.xlu0 %88 }
  0x92   :  { %v93_v20 = vmul.f32 %v145_v17, %v89_v18 }
  0x94   :  { %v96_v23 = vsel %vm95_vm3, %v93_v20, 0.0 }
  0x95   :  { %v92_v21 = vpop.xlane.xlu0 %91 }
  0x96   :  { %v94_v22 = vmul.f32 %v146_v19, %v92_v21 }
  0x98   :  { %v97_v24 = vsel %vm95_vm3, %v94_v22, 0.0 }
  0x99   :  { %v98_v27 = vadd.f32 %v97_v24, %v96_v23  ;;  %v26_v33 = vpop.xlane.xlu0 %25 }
  0x9a   :  { %v30_v34 = vadd.f32 1e-12, %v26_v33 }
  0x9b   :  { %99 = vadd.xlane.f32.xlu1 %v98_v27 }
  0x9c   :  { %156 = vrsqrt.f32 %v30_v34 }
  0x9d   :  { %v42_v35 = vpop.xlane.xlu0 %41 }
  0x9e   :  { %v46_v36 = vadd.f32 1e-12, %v42_v35 }
  0x9f   :  { %111 = vadd.xlane.f32.xlu1 %v110_v28 }
  0xa0   :  { %158 = vrsqrt.f32 %v46_v36 }
  0xa3   :  { %28 = vadd.xlane.f32.xlu1 %v27_v30 }
  0xa7   :  { %44 = vadd.xlane.f32.xlu1 %v43_v32 }
  0xa9   :  { %v157_v37 = vpop.eup %156 }
  0xaa   :  { %v34_v38 = vmul.f32 2.0, %v157_v37 }
  0xac   :  { %v36_v39 = vmul.f32 %v34_v38, %v17_v0 }
  0xad   :  { %v159_v40 = vpop.eup %158 }
  0xae   :  { %v147_v41 = vpack.c.bf16 %v36_v39, %v36_v39  ;;  %v50_v42 = vmul.f32 2.0, %v159_v40 }
  0xb0   :  { %63 = vst.msk [vmem:[%s253_s3] sm:$0xf] %vm62_vm4, %v147_v41  ;;  %v52_v43 = vmul.f32 %v50_v42, %v19_v1 }
  0xb2   :  { %v149_v44 = vpack.c.bf16 %v52_v43, %v52_v43 }
  0xb4   :  { %73 = vst.msk [vmem:[%s254_s4] sm:$0xf] %vm62_vm4, %v149_v44 }
 0x124   :  { %v100_v45 = vpop.xlane.xlu1 %99 }
 0x125   :  { %v101_v46 = vrot.slane %v100_v45, 4 }
 0x127   :  { %v102_v47 = vadd.f32 %v101_v46, %v100_v45 }
 0x128   :  { %v112_v48 = vpop.xlane.xlu1 %111 }
 0x129   :  { %v103_v49 = vrot.slane %v102_v47, 2  ;;  %v113_v50 = vrot.slane %v112_v48, 4 }
 0x12b   :  { %v114_v51 = vadd.f32 %v113_v50, %v112_v48  ;;  %v104_v52 = vadd.f32 %v103_v49, %v102_v47 }
 0x12c   :  { %v29_v53 = vpop.xlane.xlu1 %28 }
 0x12d   :  { %v115_v54 = vrot.slane %v114_v51, 2  ;;  %v105_v55 = vrot.slane %v104_v52, 1  ;;  %v31_v56 = vadd.f32 1e-12, %v29_v53 }
 0x12f   :  { %v106_v57 = vadd.f32 %v105_v55, %v104_v52  ;;  %v116_v58 = vadd.f32 %v115_v54, %v114_v51  ;;  %160 = vrsqrt.f32 %v31_v56 }
 0x130   :  { %v45_v59 = vpop.xlane.xlu1 %44 }
 0x131   :  { %151 = vpush %v106_v57  ;;  %v117_v60 = vrot.slane %v116_v58, 1  ;;  %v47_v61 = vadd.f32 1e-12, %v45_v59 }
 0x133   :  { %v118_v62 = vadd.f32 %v117_v60, %v116_v58  ;;  %162 = vrsqrt.f32 %v47_v61 }
 0x135   :  { %153 = vpush %v118_v62 }
 0x13c   :  { %v161_v63 = vpop.eup %160 }
 0x13d   :  { %v35_v0 = vmul.f32 2.0, %v161_v63 }
 0x13f   :  { %v37_v1 = vmul.f32 %v35_v0, %v204_v2 }
 0x140   :  { %v163_v3 = vpop.eup %162 }
 0x141   :  { %v148_v5 = vpack.c.bf16 %v37_v1, %v37_v1  ;;  %v51_v6 = vmul.f32 2.0, %v163_v3 }
 0x143   :  { %64 = vst.msk [vmem:[%s253_s3 + $0x4] sm:$0xf] %vm62_vm4, %v148_v5  ;;  %v53_v7 = vmul.f32 %v51_v6, %v209_v4 }
 0x145   :  { %v150_v8 = vpack.c.bf16 %v53_v7, %v53_v7 }
 0x147   :  { %74 = vst.msk [vmem:[%s254_s4 + $0x4] sm:$0xf] %vm62_vm4, %v150_v8 }
 0x162   :  { %s152_s10 = spop %151 }
 0x163   :  { %v126_v11 = vstv %s152_s10 }
 0x166   :  { %s154_s11 = spop %153 }
 0x167   :  { %v124_v2 = vstv %s154_s11 }
 0x168   :  { %v125_v12 = vsel %vm123_vm5, %v124_v2, 0.0 }
 0x169   :  { %v127_v13 = vsel %vm122_vm6, %v126_v11, %v125_v12 }
 0x16a   :  { %128 = vst [vmem:[%s255_s5] sm:$0x1] %v127_v13 }

// kernel: _forward_impl.13
= control target key start
LH: loop header
LB: loop body
LE: loop exit
PB: predicated region body
PF: predicated region fallthrough
CT: control target
= control target key end

     0   :  { %vm28_vm0 = vcmask 7168   ;;  %vm68_vm1 = vcmask 261120   ;;  %v273_v0 = vmov 0.0   ;;  %vm274_vm2 = vmmov 0   ;;  %s369_s3 = inlined_call_operand.vmem [shape: bf16[16,32], index: 3, kind: input, shape index: {}, may-alias: {1,3}]   ;;  %s370_s2 = inlined_call_operand.vmem [shape: bf16[16,32], index: 2, kind: input, shape index: {}, may-alias: {0,2}]   ;;  %s371_s4 = inlined_call_operand.vmem [shape: s32[16,1], index: 4, kind: input, shape index: {}]   ;;  %s372_s1 = inlined_call_operand.vmem [shape: bf16[16,32], index: 1, kind: input, shape index: {}, may-alias: {1,3}]   ;;  %s373_s5 = inlined_call_operand.vmem [shape: s32[1,16], index: 5, kind: input, shape index: {}]   ;;  %s374_s0 = inlined_call_operand.vmem [shape: bf16[16,32], index: 0, kind: input, shape index: {}, may-alias: {0,2}]   ;;  %s375_s6 = inlined_call_operand.vmem [shape: f32[1,1,128], index: 6, kind: output, shape index: {}]  }
   0x1   :  { %244 = vmatprep.subr.bf16.mxu0 %v273_v0  ;;  %35 = vst.msk [vmem:[#allocation5] sm:$0xff] %vm28_vm0, %v273_v0  ;;  %36 = vst.msk [vmem:[#allocation5 + $0x8] sm:$0xff] %vm28_vm0, %v273_v0  ;;  %v258_v1 = vld [vmem:[%s370_s2] sm:$0xff]   ;;  %246 = vmatprep.mubr.msk.bf16.mxu0 %vm274_vm2, %v273_v0  ;;  %v275_v2 = vmov 0   ;;  %v334_v6 = vld [vmem:[%s371_s4 + $0x8] sm:$0xff]  ;;  %vm120_vm4 = vcmask 130048  }
   0x2   :  { %256 = vset.pattern.permute.xlu0 %v275_v2  ;;  %v324_v3 = vld [vmem:[%s371_s4] sm:$0xff]  ;;  %257 = vset.pattern.permute.xlu1 %v275_v2  ;;  %v73_v4 = vsel %vm68_vm1, %v258_v1, 0  ;;  %v276_v7 = vmov -1e+30   ;;  %vm186_vm7 = vcmp.ge.s32.totalorder %v334_v6, 0 }
   0x3   :  { %47 = vperm.xlu0 %256, %v324_v3   ;;  %245 = vmatpush3.bf16.xpose.msra.mxu0 %v73_v4  ;;  %v39_v5 = vld [vmem:[%s372_s1] sm:$0xff]   ;;  %33 = vst.msk [vmem:[#allocation4] sm:$0xff] %vm28_vm0, %v276_v7  ;;  %34 = vst.msk [vmem:[#allocation4 + $0x8] sm:$0xff] %vm28_vm0, %v276_v7  ;;  %vm185_vm6 = vcmp.ge.s32.totalorder %v324_v3, 0 }
   0x4   :  { %v232_v8 = vld [vmem:[%s373_s5] ss:$0 sm:$0xff]  ;;  %v175_v35 = vunpack.c.l.bf16 %v39_v5  ;;  %v176_v39 = vunpack.c.h.bf16 %v39_v5 }
   0x5   :  { %v239_v33 = vld [vmem:[%s374_s0] sm:$0xff]  }
   0x6   :  { %v240_v34 = vunpack.c.l.bf16 %v239_v33  ;;  %v241_v38 = vunpack.c.h.bf16 %v239_v33 }
   0x7   :  { %50 = vperm.xlu0 %256, %v334_v6  }
   0x8   :  { %v177_v37 = vmul.f32 %v240_v34, %v175_v35  ;;  %v178_v44 = vmul.f32 %v241_v38, %v176_v39  ;;  %v147_v51 = vld [vmem:[#allocation5] sm:$0xff]  ;;  %v148_v55 = vld [vmem:[#allocation5 + $0x8] sm:$0xff] }
   0xa   :  { %247 = vmatmul.mubr.msk.bf16.vlgmr.msra.gmra.mxu0 %vm68_vm1, %v39_v5  ;;  %v118_v19 = vld [vmem:[#allocation4] sm:$0xff]  ;;  %v119_v22 = vld [vmem:[#allocation4 + $0x8] sm:$0xff]  ;;  %v179_v43 = vsel %vm68_vm1, %v177_v37, 0.0  ;;  %v182_v47 = vsel %vm68_vm1, %v178_v44, 0.0 }
  0x7e   :  { %v48_v9 = vpop.permute.xlu0 %47 }
  0x7f   :  { %vm56_vm3 = vcmp.eq.s32.totalorder %v48_v9, %v232_v8 }
  0x82   :  { %v51_v11 = vpop.permute.xlu0 %50 }
  0x83   :  { %vm57_vm5 = vcmp.eq.s32.totalorder %v51_v11, %v232_v8  ;;  %v236_v11 = vsel %vm185_vm6, 1.0, %v273_v0 }
  0xca   :  { %v109_v10 = vpop.f32.mrf.mxu0 }
  0xcb   :  { %v116_v12 = vsel %vm56_vm3, %v109_v10, -1e+30 }
  0xcc   :  { %v248_v13 = vpop.f32.mrf.mxu0  ;;  %v121_v14 = vsel %vm120_vm4, %v116_v12, -inf }
  0xcd   :  { %122 = vmax.xlane.f32.xlu1 %v121_v14 }
  0xce   :  { %v112_v15 = vpop.f32.mrf.mxu0 }
  0xcf   :  { %v117_v16 = vsel %vm57_vm5, %v112_v15, -1e+30  ;;  %v237_v15 = vsel %vm186_vm7, 1.0, %v273_v0 }
  0xd0   :  { %v249_v17 = vpop.f32.mrf.mxu0  ;;  %v124_v18 = vsel %vm120_vm4, %v117_v16, -inf }
  0xd1   :  { %125 = vmax.xlane.f32.xlu1 %v124_v18 }
 0x156   :  { %v123_v20 = vpop.xlane.xlu1 %122 }
 0x157   :  { %v127_v21 = vmax.f32 %v118_v19, %v123_v20 }
 0x159   :  { %v149_v23 = vsub.f32 %v118_v19, %v127_v21  ;;  %168 = vst.msk [vmem:[#allocation4] sm:$0xff] %vm28_vm0, %v127_v21  ;;  %131 = vperm.xlu0 %256, %v127_v21  }
 0x15a   :  { %v126_v24 = vpop.xlane.xlu1 %125 }
 0x15b   :  { %v128_v25 = vmax.f32 %v119_v22, %v126_v24  ;;  %v151_v48 = vmul.f32 1.442695, %v149_v23 }
 0x15d   :  { %v150_v26 = vsub.f32 %v119_v22, %v128_v25  ;;  %169 = vst.msk [vmem:[#allocation4 + $0x8] sm:$0xff] %vm28_vm0, %v128_v25  ;;  %136 = vperm.xlu1 %257, %v128_v25  }
 0x15f   :  { %v153_v49 = vmul.f32 1.442695, %v150_v26 }
 0x160   :  { %v191_v5 = vld [vmem:[#allocation4] sm:$0xff] }
 0x1d4   :  { %v132_v27 = vpop.permute.xlu0 %131 }
 0x1d5   :  { %v139_v28 = vsub.f32 %v116_v12, %v132_v27  ;;  %v192_v12 = vld [vmem:[#allocation4 + $0x8] sm:$0xff]  ;;  %v220_v27 = vlaneseq }
 0x1d7   :  { %v141_v29 = vmul.f32 1.442695, %v139_v28  ;;  %v221_v28 = vand.u32 127, %v220_v27 }
 0x1d8   :  { %v137_v30 = vpop.permute.xlu1 %136 }
 0x1d9   :  { %261 = vpow2.f32 %v141_v29  ;;  %v140_v31 = vsub.f32 %v117_v16, %v137_v30  ;;  %vm223_vm8 = vcmp.eq.s32.totalorder %v221_v28, 1  ;;  %vm222_vm9 = vcmp.eq.s32.totalorder %v221_v28, 0 }
 0x1db   :  { %v143_v32 = vmul.f32 1.442695, %v140_v31 }
 0x1dd   :  { %263 = vpow2.f32 %v143_v32 }
 0x1de   :  { %265 = vpow2.f32 %v151_v48 }
 0x1df   :  { %267 = vpow2.f32 %v153_v49 }
 0x1e6   :  { %v262_v36 = vpop.eup %261 }
 0x1e7   :  { %v145_v40 = vsel %vm56_vm3, %v262_v36, 0.0 }
 0x1e8   :  { %v157_v41 = vsel %vm120_vm4, %v145_v40, 0.0 }
 0x1e9   :  { %158 = vadd.xlane.f32.xlu0 %v157_v41 }
 0x1ea   :  { %v264_v42 = vpop.eup %263 }
 0x1eb   :  { %v146_v45 = vsel %vm57_vm5, %v264_v42, 0.0  ;;  %v266_v50 = vpop.eup %265 }
 0x1ec   :  { %v160_v46 = vsel %vm120_vm4, %v146_v45, 0.0  ;;  %v155_v52 = vmul.f32 %v266_v50, %v147_v51  ;;  %v268_v53 = vpop.eup %267 }
 0x1ed   :  { %161 = vadd.xlane.f32.xlu1 %v160_v46  ;;  %180 = vadd.xlane.f32.xlu0 %v179_v43  ;;  %v156_v57 = vmul.f32 %v268_v53, %v148_v55 }
 0x1f1   :  { %183 = vadd.xlane.f32.xlu0 %v182_v47 }
 0x272   :  { %v159_v54 = vpop.xlane.xlu0 %158 }
 0x273   :  { %v163_v56 = vadd.f32 %v159_v54, %v155_v52 }
 0x275   :  { %166 = vst.msk [vmem:[#allocation5] sm:$0xff] %vm28_vm0, %v163_v56 }
 0x276   :  { %v162_v58 = vpop.xlane.xlu1 %161  ;;  %v181_v2 = vpop.xlane.xlu0 %180 }
 0x277   :  { %v164_v59 = vadd.f32 %v162_v58, %v156_v57 }
 0x279   :  { %167 = vst.msk [vmem:[#allocation5 + $0x8] sm:$0xff] %vm28_vm0, %v164_v59 }
 0x27a   :  { %v184_v13 = vpop.xlane.xlu0 %183 }
 0x27c   :  { %v193_v60 = vld [vmem:[#allocation5] sm:$0xff] }
 0x27d   :  { %v195_v61 = vmax.f32 %v193_v60, 1e-30 }
 0x27f   :  { %269 = vlog2.f32 %v195_v61 }
 0x280   :  { %v194_v62 = vld [vmem:[#allocation5 + $0x8] sm:$0xff] }
 0x281   :  { %v196_v63 = vmax.f32 %v194_v62, 1e-30 }
 0x283   :  { %271 = vlog2.f32 %v196_v63 }
 0x28c   :  { %v270_v1 = vpop.eup %269 }
 0x28d   :  { %v198_v4 = vmul.f32 0.6931472, %v270_v1 }
 0x28f   :  { %v201_v7 = vadd.f32 %v198_v4, %v191_v5 }
 0x290   :  { %v272_v8 = vpop.eup %271 }
 0x291   :  { %v203_v9 = vsub.f32 %v181_v2, %v201_v7  ;;  %v200_v10 = vmul.f32 0.6931472, %v272_v8 }
 0x293   :  { %v202_v14 = vadd.f32 %v200_v10, %v192_v12  ;;  %v205_v16 = vmul.f32 %v236_v11, %v203_v9 }
 0x295   :  { %v204_v17 = vsub.f32 %v184_v13, %v202_v14  ;;  %v207_v19 = vsel %vm28_vm0, %v205_v16, 0.0 }
 0x297   :  { %v206_v18 = vmul.f32 %v237_v15, %v204_v17 }
 0x299   :  { %v208_v3 = vsel %vm28_vm0, %v206_v18, 0.0 }
 0x29a   :  { %v209_v20 = vadd.f32 %v208_v3, %v207_v19 }
 0x29c   :  { %210 = vadd.xlane.f32.xlu0 %v209_v20 }
 0x325   :  { %v211_v21 = vpop.xlane.xlu0 %210 }
 0x326   :  { %v212_v6 = vrot.slane %v211_v21, 4 }
 0x328   :  { %v213_v22 = vadd.f32 %v212_v6, %v211_v21 }
 0x32a   :  { %v214_v23 = vrot.slane %v213_v22, 2 }
 0x32c   :  { %v215_v24 = vadd.f32 %v214_v23, %v213_v22 }
 0x32e   :  { %v216_v25 = vrot.slane %v215_v24, 1 }
 0x330   :  { %v217_v26 = vadd.f32 %v216_v25, %v215_v24 }
 0x332   :  { %250 = vpush %v217_v26 }
 0x363   :  { %s251_s0 = spop %250 }
 0x364   :  { %s219_s5 = ssub.f32 0.0, %s251_s0 }
 0x366   :  { %v224_v0 = vstv %s219_s5 }
 0x367   :  { %v225_v29 = vsel %vm223_vm8, %v224_v0, 0.0 }
 0x368   :  { %v226_v30 = vsel %vm222_vm9, 0.0, %v225_v29 }
 0x369   :  { %227 = vst [vmem:[%s375_s6] sm:$0x1] %v226_v30 }

</bundles_post_ra>
